<compile_context>
chip_gen: v7x
topology: tpu7x:2x2x1
jax: 0.10.0
libtpu: 0.0.40
codegen_flags: <defaults>
</compile_context>

<pallas_src>
import functools

import numpy as np
import jax
import jax.numpy as jnp
from jax.experimental import pallas as pl
from jax.experimental.pallas import tpu as pltpu


def _get_pos_code(fm_sz: int) -> np.ndarray:
    """Replicates SelfAttention.__getPosCode (single (fm_sz, fm_sz) slice; the
    torch version tiles this identical slice over out_c channels and batch)."""
    row = []
    for i in range(fm_sz):
        fn = np.sin if i % 2 == 0 else np.cos
        row.append(fn(1.0 / 10000 ** ((i // 2) / fm_sz)))
    x = np.array([row], dtype=np.float32)          # (1, fm_sz)
    return (x + x.T).astype(np.float32)            # (fm_sz, fm_sz)


def fuse_params(wq, wk, wv, bq, bk, bv, pos):
    """One-time parameter fusion. Call once at setup, NOT per forward call."""
    head_n, out_c, in_c = wq.shape
    C = head_n * out_c
    # Rows ordered [q(h0 c0..), q(h1 c0..), k(...), v(...)] -> output channel
    # index h*out_c + oc matches torch.cat(results, dim=1).
    w_cat = jnp.concatenate(
        [wq.reshape(C, in_c), wk.reshape(C, in_c), wv.reshape(C, in_c)],
        axis=0).astype(jnp.float32)                 # (3C, in_c)
    b_cat = jnp.concatenate(
        [bq.reshape(C, 1), bk.reshape(C, 1), bv.reshape(C, 1)],
        axis=0).astype(jnp.float32)                 # (3C, 1)
    pos_row = jnp.asarray(pos, jnp.float32).reshape(1, -1)   # (1, S*S) lane-dense
    return w_cat, b_cat, pos_row


def _mhsa_kernel(x_ref, w_ref, b_ref, pos_ref, o_ref, *,
                 B: int, head_n: int, out_c: int, S: int, pos_bias: bool):
    C = head_n * out_c
    SS = S * S

    w = w_ref[...]                                  # (3C, in_c)
    bias = b_ref[...]                               # (3C, 1)
    pos_row = pos_ref[...]                          # (1, SS)

    # Single grid step: both batches handled here (B is tiny, static unroll).
    for b in range(B):
        xb = x_ref[b]                               # (in_c, SS)

        # All 1x1 convs (q, k, v for every head) in one MXU pass per batch.
        qkv = jnp.dot(w, xb, preferred_element_type=jnp.float32) + bias   # (3C, SS)
        q = qkv[0:C]                                # (C, SS) lane-dense
        k = qkv[C:2 * C]
        v = qkv[2 * C:3 * C]

        if not pos_bias:
            # q@k^T + q@pos^T == q@(k + pos)^T : fold pos into k on the
            # lane-dense (C, SS) form (pos_row broadcasts over channels).
            k = k + pos_row

        # Only relayout into the matmul-friendly layout for the attention dot.
        q3 = q.reshape(C, S, S)
        k3 = k.reshape(C, S, S)

        # One batched MXU pass over the channel axis (no per-channel Python
        # loop, no jnp.stack): att_c = q_c @ k_c^T for all c.
        att3 = jnp.einsum('cij,ckj->cik', q3, k3,
                          preferred_element_type=jnp.float32)   # (C, S, S)

        # Back to lane-dense (C, SS) = (8, 256) for everything that follows.
        att = att3.reshape(C, SS)
        if pos_bias:
            att = att + pos_row                     # additive bias, flattened

        # Softmax over the flattened S*S axis per channel (exact divide: the
        # approx reciprocal was responsible for the tolerance failure).
        m = jnp.max(att, axis=-1, keepdims=True)
        e = jnp.exp(att - m)
        denom = jnp.sum(e, axis=-1, keepdims=True)
        soft = e / denom

        # Lane-dense (C, SS) = (8, 256) store into the (B, C, SS) output slab.
        o_ref[b] = soft * v


def multi_head_self_attention(x, w_cat, b_cat, pos_row, *,
                              head_n: int, out_c: int, pos_bias: bool = False):
    """x: (B, in_c, S, S) float32 (NCHW).
    w_cat/b_cat/pos_row: pre-fused via fuse_params (done once at setup).
    Returns (B, head_n*out_c, S, S), matching torch.cat(results, dim=1)."""
    B, in_c, S, _ = x.shape
    C = head_n * out_c
    SS = S * S

    xf = x.reshape(B, in_c, SS).astype(jnp.float32)   # pure reshape, no transpose

    kernel = functools.partial(_mhsa_kernel, B=B, head_n=head_n, out_c=out_c,
                               S=S, pos_bias=pos_bias)

    out = pl.pallas_call(
        kernel,
        out_shape=jax.ShapeDtypeStruct((B, C, SS), jnp.float32),
        grid_spec=pltpu.PrefetchScalarGridSpec(
            num_scalar_prefetch=0,
            grid=(1,),                                  # single step: DMA once
            in_specs=[
                pl.BlockSpec((B, in_c, SS), lambda i: (0, 0, 0)),   # x
                pl.BlockSpec((3 * C, in_c), lambda i: (0, 0)),      # w_cat
                pl.BlockSpec((3 * C, 1), lambda i: (0, 0)),         # b_cat
                pl.BlockSpec((1, SS), lambda i: (0, 0)),            # pos_row
            ],
            out_specs=pl.BlockSpec((B, C, SS), lambda i: (0, 0, 0)),
        ),
        compiler_params=pltpu.CompilerParams(
            dimension_semantics=("arbitrary",)),
    )(xf, w_cat, b_cat, pos_row)

    # (B, C, SS) -> (B, head_n*out_c, S, S): pure reshape, no transpose.
    return out.reshape(B, C, S, S)


def _reference(x, wq, wk, wv, bq, bk, bv, pos, *, pos_bias=False):
    """Pure-JAX reference mirroring the PyTorch forward (exact-precision matmuls)."""
    B, in_c, S, _ = x.shape
    head_n, out_c, _ = wq.shape
    hp = jax.lax.Precision.HIGHEST
    xf = x.reshape(B, in_c, S * S)
    outs = []
    for h in range(head_n):
        q = (jnp.einsum('oi,bip->bop', wq[h], xf, precision=hp)
             + bq[h][None]).reshape(B, out_c, S, S)
        k = (jnp.einsum('oi,bip->bop', wk[h], xf, precision=hp)
             + bk[h][None]).reshape(B, out_c, S, S)
        v = (jnp.einsum('oi,bip->bop', wv[h], xf, precision=hp)
             + bv[h][None]).reshape(B, out_c, S, S)
        qk = jnp.einsum('bcij,bckj->bcik', q, k, precision=hp)
        if pos_bias:
            att = qk + pos[None, None]
        else:
            att = qk + jnp.einsum('bcij,kj->bcik', q, pos, precision=hp)
        att_flat = att.reshape(B, out_c, S * S)
        soft = jax.nn.softmax(att_flat, axis=-1).reshape(B, out_c, S, S)
        outs.append(soft * v)
    return jnp.concatenate(outs, axis=1)


if __name__ == "__main__":
    B, in_c, out_c, head_n, fm_sz = 2, 4, 4, 2, 16

    key = jax.random.PRNGKey(0)
    k_x, k_wq, k_wk, k_wv, k_bq, k_bk, k_bv = jax.random.split(key, 7)

    x = jax.random.normal(k_x, (B, in_c, fm_sz, fm_sz), dtype=jnp.float32)
    scale = 1.0 / np.sqrt(in_c)
    wq = jax.random.normal(k_wq, (head_n, out_c, in_c), dtype=jnp.float32) * scale
    wk = jax.random.normal(k_wk, (head_n, out_c, in_c), dtype=jnp.float32) * scale
    wv = jax.random.normal(k_wv, (head_n, out_c, in_c), dtype=jnp.float32) * scale
    bq = jax.random.normal(k_bq, (head_n, out_c, 1), dtype=jnp.float32) * 0.1
    bk = jax.random.normal(k_bk, (head_n, out_c, 1), dtype=jnp.float32) * 0.1
    bv = jax.random.normal(k_bv, (head_n, out_c, 1), dtype=jnp.float32) * 0.1
    pos = jnp.asarray(_get_pos_code(fm_sz))

    # One-time parameter fusion, outside the per-call path.
    w_cat, b_cat, pos_row = fuse_params(wq, wk, wv, bq, bk, bv, pos)

    for pos_bias in (False, True):
        out = multi_head_self_attention(x, w_cat, b_cat, pos_row,
                                        head_n=head_n, out_c=out_c,
                                        pos_bias=pos_bias)
        out = jax.block_until_ready(out)
        ref = _reference(x, wq, wk, wv, bq, bk, bv, pos, pos_bias=pos_bias)
        assert out.shape == (B, head_n * out_c, fm_sz, fm_sz)
        np.testing.assert_allclose(np.asarray(out), np.asarray(ref),
                                   rtol=2e-3, atol=2e-3)

    print("KERNEL_OK")
</pallas_src>

<mosaic_0001>
module attributes {stable_mosaic.version = 11 : i64} {
  func.func @_mhsa_kernel(%arg0: i32, %arg1: memref<2x4x256xf32, #tpu.memory_space<vmem>>, %arg2: memref<24x4xf32, #tpu.memory_space<vmem>>, %arg3: memref<24x1xf32, #tpu.memory_space<vmem>>, %arg4: memref<1x256xf32, #tpu.memory_space<vmem>>, %arg5: memref<2x8x256xf32, #tpu.memory_space<vmem>>) attributes {dimension_semantics = [#tpu.dimension_semantics<arbitrary>], iteration_bounds = array<i64: 1>, scalar_prefetch = 0 : i64, scratch_operands = 0 : i64, tpu.core_type = #tpu.core_type<tc>, window_params = [{pipeline_mode = #tpu.pipeline_mode<synchronous>, transform_indices = @transform_0, window_bounds = array<i64: 2, 4, 256>}, {pipeline_mode = #tpu.pipeline_mode<synchronous>, transform_indices = @transform_1, window_bounds = array<i64: 24, 4>}, {pipeline_mode = #tpu.pipeline_mode<synchronous>, transform_indices = @transform_2, window_bounds = array<i64: 24, 1>}, {pipeline_mode = #tpu.pipeline_mode<synchronous>, transform_indices = @transform_3, window_bounds = array<i64: 1, 256>}, {pipeline_mode = #tpu.pipeline_mode<synchronous>, transform_indices = @transform_4, window_bounds = array<i64: 2, 8, 256>}]} {
    %c0 = arith.constant 0 : index
    %c0_0 = arith.constant 0 : index
    %0 = vector.load %arg2[%c0, %c0_0] : memref<24x4xf32, #tpu.memory_space<vmem>>, vector<24x4xf32>
    %c0_1 = arith.constant 0 : index
    %c0_2 = arith.constant 0 : index
    %1 = vector.load %arg3[%c0_1, %c0_2] : memref<24x1xf32, #tpu.memory_space<vmem>>, vector<24x1xf32>
    %c0_3 = arith.constant 0 : index
    %c0_4 = arith.constant 0 : index
    %2 = vector.load %arg4[%c0_3, %c0_4] : memref<1x256xf32, #tpu.memory_space<vmem>>, vector<1x256xf32>
    %c0_5 = arith.constant 0 : index
    %c0_6 = arith.constant 0 : index
    %c0_7 = arith.constant 0 : index
    %3 = vector.load %arg1[%c0_5, %c0_6, %c0_7] : memref<2x4x256xf32, #tpu.memory_space<vmem>>, vector<1x4x256xf32>
    %4 = vector.shape_cast %3 : vector<1x4x256xf32> to vector<4x256xf32>
    %cst = arith.constant dense<0.000000e+00> : vector<24x256xf32>
    %5 = tpu.matmul %0, %4, %cst {dimension_numbers = #tpu.dot_dimension_numbers<[1], [0], [0], [1], [0, 0, 1, 1], [], []>} : vector<24x4xf32>, vector<4x256xf32>, vector<24x256xf32> -> vector<24x256xf32>
    %6 = vector.broadcast %1 : vector<24x1xf32> to vector<24x256xf32>
    %7 = arith.addf %5, %6 : vector<24x256xf32>
    %8 = vector.extract_strided_slice %7 {offsets = [0, 0], sizes = [8, 256], strides = [1, 1]} : vector<24x256xf32> to vector<8x256xf32>
    %9 = vector.extract_strided_slice %7 {offsets = [8, 0], sizes = [8, 256], strides = [1, 1]} : vector<24x256xf32> to vector<8x256xf32>
    %10 = vector.extract_strided_slice %7 {offsets = [16, 0], sizes = [8, 256], strides = [1, 1]} : vector<24x256xf32> to vector<8x256xf32>
    %11 = vector.broadcast %2 : vector<1x256xf32> to vector<8x256xf32>
    %12 = arith.addf %9, %11 : vector<8x256xf32>
    %13 = vector.shape_cast %8 : vector<8x256xf32> to vector<8x16x16xf32>
    %14 = vector.shape_cast %12 : vector<8x256xf32> to vector<8x16x16xf32>
    "tpu.trace_start"() <{level = 10 : i32, message = "cij,ckj->cik"}> : () -> ()
    %cst_8 = arith.constant dense<0.000000e+00> : vector<8x16x16xf32>
    %15 = tpu.matmul %13, %14, %cst_8 {dimension_numbers = #tpu.dot_dimension_numbers<[2], [2], [1], [1], [0, 0, 0, 1, 1, 1], [0], [0]>} : vector<8x16x16xf32>, vector<8x16x16xf32>, vector<8x16x16xf32> -> vector<8x16x16xf32>
    "tpu.trace_stop"() : () -> ()
    %16 = vector.shape_cast %15 : vector<8x16x16xf32> to vector<8x256xf32>
    %cst_9 = arith.constant dense<0xFF800000> : vector<8xf32>
    %17 = vector.multi_reduction <maximumf>, %16, %cst_9 [1] : vector<8x256xf32> to vector<8xf32>
    %18 = vector.shape_cast %17 : vector<8xf32> to vector<8x1xf32>
    %19 = vector.broadcast %18 : vector<8x1xf32> to vector<8x256xf32>
    %20 = arith.subf %16, %19 : vector<8x256xf32>
    %21 = math.exp %20 : vector<8x256xf32>
    %cst_10 = arith.constant dense<0.000000e+00> : vector<8xf32>
    %22 = vector.multi_reduction <add>, %21, %cst_10 [1] : vector<8x256xf32> to vector<8xf32>
    %23 = vector.shape_cast %22 : vector<8xf32> to vector<8x1xf32>
    %24 = vector.broadcast %23 : vector<8x1xf32> to vector<8x256xf32>
    %25 = arith.divf %21, %24 : vector<8x256xf32>
    %26 = arith.mulf %25, %10 : vector<8x256xf32>
    %c0_11 = arith.constant 0 : index
    %c0_12 = arith.constant 0 : index
    %c0_13 = arith.constant 0 : index
    %27 = vector.load %arg5[%c0_11, %c0_12, %c0_13] : memref<2x8x256xf32, #tpu.memory_space<vmem>>, vector<1x8x256xf32>
    %28 = vector.shape_cast %27 : vector<1x8x256xf32> to vector<8x256xf32>
    %29 = vector.shape_cast %26 : vector<8x256xf32> to vector<1x8x256xf32>
    tpu.vector_store %arg5[%c0_11, %c0_12, %c0_13], %29 {strides = array<i32>} : memref<2x8x256xf32, #tpu.memory_space<vmem>>, vector<1x8x256xf32>,
    %c1 = arith.constant 1 : index
    %c0_14 = arith.constant 0 : index
    %c0_15 = arith.constant 0 : index
    %30 = vector.load %arg1[%c1, %c0_14, %c0_15] : memref<2x4x256xf32, #tpu.memory_space<vmem>>, vector<1x4x256xf32>
    %31 = vector.shape_cast %30 : vector<1x4x256xf32> to vector<4x256xf32>
    %cst_16 = arith.constant dense<0.000000e+00> : vector<24x256xf32>
    %32 = tpu.matmul %0, %31, %cst_16 {dimension_numbers = #tpu.dot_dimension_numbers<[1], [0], [0], [1], [0, 0, 1, 1], [], []>} : vector<24x4xf32>, vector<4x256xf32>, vector<24x256xf32> -> vector<24x256xf32>
    %33 = vector.broadcast %1 : vector<24x1xf32> to vector<24x256xf32>
    %34 = arith.addf %32, %33 : vector<24x256xf32>
    %35 = vector.extract_strided_slice %34 {offsets = [0, 0], sizes = [8, 256], strides = [1, 1]} : vector<24x256xf32> to vector<8x256xf32>
    %36 = vector.extract_strided_slice %34 {offsets = [8, 0], sizes = [8, 256], strides = [1, 1]} : vector<24x256xf32> to vector<8x256xf32>
    %37 = vector.extract_strided_slice %34 {offsets = [16, 0], sizes = [8, 256], strides = [1, 1]} : vector<24x256xf32> to vector<8x256xf32>
    %38 = vector.broadcast %2 : vector<1x256xf32> to vector<8x256xf32>
    %39 = arith.addf %36, %38 : vector<8x256xf32>
    %40 = vector.shape_cast %35 : vector<8x256xf32> to vector<8x16x16xf32>
    %41 = vector.shape_cast %39 : vector<8x256xf32> to vector<8x16x16xf32>
    "tpu.trace_start"() <{level = 10 : i32, message = "cij,ckj->cik"}> : () -> ()
    %cst_17 = arith.constant dense<0.000000e+00> : vector<8x16x16xf32>
    %42 = tpu.matmul %40, %41, %cst_17 {dimension_numbers = #tpu.dot_dimension_numbers<[2], [2], [1], [1], [0, 0, 0, 1, 1, 1], [0], [0]>} : vector<8x16x16xf32>, vector<8x16x16xf32>, vector<8x16x16xf32> -> vector<8x16x16xf32>
    "tpu.trace_stop"() : () -> ()
    %43 = vector.shape_cast %42 : vector<8x16x16xf32> to vector<8x256xf32>
    %cst_18 = arith.constant dense<0xFF800000> : vector<8xf32>
    %44 = vector.multi_reduction <maximumf>, %43, %cst_18 [1] : vector<8x256xf32> to vector<8xf32>
    %45 = vector.shape_cast %44 : vector<8xf32> to vector<8x1xf32>
    %46 = vector.broadcast %45 : vector<8x1xf32> to vector<8x256xf32>
    %47 = arith.subf %43, %46 : vector<8x256xf32>
    %48 = math.exp %47 : vector<8x256xf32>
    %cst_19 = arith.constant dense<0.000000e+00> : vector<8xf32>
    %49 = vector.multi_reduction <add>, %48, %cst_19 [1] : vector<8x256xf32> to vector<8xf32>
    %50 = vector.shape_cast %49 : vector<8xf32> to vector<8x1xf32>
    %51 = vector.broadcast %50 : vector<8x1xf32> to vector<8x256xf32>
    %52 = arith.divf %48, %51 : vector<8x256xf32>
    %53 = arith.mulf %52, %37 : vector<8x256xf32>
    %c1_20 = arith.constant 1 : index
    %c0_21 = arith.constant 0 : index
    %c0_22 = arith.constant 0 : index
    %54 = vector.load %arg5[%c1_20, %c0_21, %c0_22] : memref<2x8x256xf32, #tpu.memory_space<vmem>>, vector<1x8x256xf32>
    %55 = vector.shape_cast %54 : vector<1x8x256xf32> to vector<8x256xf32>
    %56 = vector.shape_cast %53 : vector<8x256xf32> to vector<1x8x256xf32>
    tpu.vector_store %arg5[%c1_20, %c0_21, %c0_22], %56 {strides = array<i32>} : memref<2x8x256xf32, #tpu.memory_space<vmem>>, vector<1x8x256xf32>,
    return
  }
  func.func @transform_0(%arg0: i32) -> (i32, i32, i32) {
    %c0_i32 = arith.constant 0 : i32
    %c0_i32_0 = arith.constant 0 : i32
    %c0_i32_1 = arith.constant 0 : i32
    %c0_i32_2 = arith.constant 0 : i32
    return %c0_i32, %c0_i32_0, %c0_i32_1 : i32, i32, i32
  }
  func.func @transform_1(%arg0: i32) -> (i32, i32) {
    %c0_i32 = arith.constant 0 : i32
    %c0_i32_0 = arith.constant 0 : i32
    %c0_i32_1 = arith.constant 0 : i32
    return %c0_i32, %c0_i32_0 : i32, i32
  }
  func.func @transform_2(%arg0: i32) -> (i32, i32) {
    %c0_i32 = arith.constant 0 : i32
    %c0_i32_0 = arith.constant 0 : i32
    %c0_i32_1 = arith.constant 0 : i32
    return %c0_i32, %c0_i32_0 : i32, i32
  }
  func.func @transform_3(%arg0: i32) -> (i32, i32) {
    %c0_i32 = arith.constant 0 : i32
    %c0_i32_0 = arith.constant 0 : i32
    %c0_i32_1 = arith.constant 0 : i32
    return %c0_i32, %c0_i32_0 : i32, i32
  }
  func.func @transform_4(%arg0: i32) -> (i32, i32, i32) {
    %c0_i32 = arith.constant 0 : i32
    %c0_i32_0 = arith.constant 0 : i32
    %c0_i32_1 = arith.constant 0 : i32
    %c0_i32_2 = arith.constant 0 : i32
    return %c0_i32, %c0_i32_0, %c0_i32_1 : i32, i32, i32
  }
}

</mosaic_0001>

<bundles_post_ra>
// kernel: tpu_custom_call.1
= control target key start
LH: loop header
LB: loop body
LE: loop exit
PB: predicated region body
PF: predicated region fallthrough
CT: control target
= control target key end

     0   :  { %vm53_vm0 = vcmask 1043456   ;;  %v4049_v2 = vmov 0.0   ;;  %s5034_s0 = inlined_call_operand.vmem [shape: f32[2,4,256], index: 0, kind: input, shape index: {}]   ;;  %s5035_s1 = inlined_call_operand.vmem [shape: f32[24,4], index: 1, kind: input, shape index: {}]   ;;  %s5036_s2 = inlined_call_operand.vmem [shape: f32[24,1], index: 2, kind: input, shape index: {}]   ;;  %s5037_s3 = inlined_call_operand.vmem [shape: f32[1,256], index: 3, kind: input, shape index: {}]   ;;  %s5038_s4 = inlined_call_operand.hbm [shape: f32[2,8,256], index: 4, kind: output, shape index: {}]  }
   0x1   :  { %v25_v0 = vld [vmem:[%s5034_s0] sm:$0xff]  ;;  %122 = vmatprep.mubr.f32.mxu0 %v4049_v2  ;;  %v22_v3 = vld [vmem:[%s5036_s2 + $0x8] sm:$0xff] }
   0x2   :  { %v42_v1 = vcombine.high %v25_v0, %v25_v0 }
   0x3   :  { %9 = vsyncpa [#allocation3], 0  ;;  %v4097_v4 = vld [vmem:[%s5035_s1] sm:$0xff]  ;;  %vm43_vm1 = vcmask 31744   ;;  %v4050_v5 = vmov 0   ;;  %v4110_v7 = vld [vmem:[%s5035_s1 + $0x8] sm:$0xff]  ;;  %v142_v13 = vlaneseq }
   0x4   :  { %4009 = vset.pattern.permute.xlu0 %v4050_v5  ;;  %4010 = vset.pattern.permute.xlu1 %v4050_v5  ;;  %v21_v6 = vld [vmem:[%s5036_s2] sm:$0xff]  ;;  %s4051_s25 = smov 96   ;;  %s4052_s26 = smov 112   ;;  %v4143_v19 = vld [vmem:[%s5035_s1 + $0x10] sm:$0xff]  ;;  %v4058_v28 = vmov 1983009808  }
   0x5   :  { %3649 = vmatprep.subr.msk.mxu0 %vm53_vm0, %v42_v1  ;;  %33 = vperm.xlu0 %4009, %v22_v3   ;;  %v4126_v15 = vshrl.u32 %v142_v13, 7  ;;  %s4053_s27 = smov 64   ;;  %s4054_s28 = smov 80   ;;  %v24_v18 = vld [vmem:[%s5037_s3] sm:$0x3]  ;;  %v201_v29 = vunpack.c.l.s4 %v4058_v28  ;;  %vm786_vm2 = vcmask 130048  }
   0x6   :  { %3650 = vmatpush1.msk.msra.mxu0 %vm53_vm0, %v25_v0  ;;  %s4055_s5 = smov 32   ;;  %s4056_s6 = smov 48   ;;  %v4059_v40 = vmov 1934713408   ;;  %vm4342_vm3 = vmpackc.low %vm786_vm2, %vm786_vm2  ;;  %vm1812_vm4 = vcmask 261120   ;;  %vm1814_vm5 = vcmask 392192  }
   0x7   :  { %3651 = vmatmul.mubr.msk.f32.vlgmr.msra.gmra.mrb[0].mxu0 %vm43_vm1, %v4097_v4  ;;  %v144_v17 = vsub.s32 0, %v4126_v15  ;;  %s4057_s3 = smov 16   ;;  %v148_v24 = vsub.s32 1, %v4126_v15  ;;  %v202_v30 = vunpack.c.0.s8 %v201_v29  ;;  %v265_v41 = vunpack.c.l.s4 %v4059_v40 }
   0x8   :  { %128 = vmatprep.mubr.f32.mxu0 %v4049_v2  ;;  %vm1816_vm6 = vcmask 523264   ;;  %vm1818_vm7 = vcmask 654336   ;;  %vm1820_vm8 = vcmask 785408   ;;  %vm1822_vm9 = vcmask 916480  }
   0x9   :  { %28 = vperm.xlu0 %4009, %v21_v6   ;;  %v4151_v22 = vrot.slane %v24_v18, %v144_v17  ;;  %v4170_v26 = vrot.slane %v24_v18, %v148_v24  ;;  %v4208_v33 = vsub.s32 %v202_v30, %v4126_v15  ;;  %v266_v48 = vunpack.c.0.s8 %v265_v41 }
   0xb   :  { %3652 = vmatmul.mubr.msk.f32.gmra.mrb[2].mxu0 %vm43_vm1, %v4110_v7  ;;  %v4238_v56 = vsub.s32 %v266_v48, %v4126_v15 }
   0xc   :  { %134 = vmatprep.mubr.f32.mxu0 %v4049_v2 }
   0xf   :  { %3653 = vmatmul.mubr.msk.f32.gmra.mrb[4].mxu0 %vm43_vm1, %v4143_v19 }
  0x84   :  { %v4115_v8 = vpop.permute.xlu0 %33 }
  0x88   :  { %v4117_v9 = vpop.permute.xlu0 %28 }
  0xda   :  { %v124_v10 = vpop.f32.mrb[0].mxu0 }
  0xdb   :  { %v4120_v11 = vadd.f32 %v124_v10, %v4117_v9  ;;  %v126_v12 = vpop.f32.mrb[1].mxu0 }
  0xdc   :  { %v4148_v20 = vadd.f32 %v126_v12, %v4117_v9 }
  0xdd   :  { %158 = vrot.lane.b32.xlu1 %v4120_v11, %s4051_s25  ;;  %155 = vrot.lane.b32.xlu0 %v4120_v11, %s4052_s26 }
  0xde   :  { %v130_v14 = vpop.f32.mrb[2].mxu0 }
  0xdf   :  { %v132_v16 = vpop.f32.mrb[3].mxu0  ;;  %v131_v21 = vadd.f32 %v130_v14, %v4115_v8 }
  0xe0   :  { %v133_v25 = vadd.f32 %v132_v16, %v4115_v8 }
  0xe1   :  { %164 = vrot.lane.b32.xlu1 %v4120_v11, %s4053_s27  ;;  %161 = vrot.lane.b32.xlu0 %v4120_v11, %s4054_s28  ;;  %v4158_v23 = vadd.f32 %v4151_v22, %v131_v21 }
  0xe2   :  { %v4177_v27 = vadd.f32 %v4170_v26, %v133_v25 }
  0xe5   :  { %170 = vrot.lane.b32.xlu1 %v4120_v11, %s4055_s5  ;;  %167 = vrot.lane.b32.xlu0 %v4120_v11, %s4056_s6 }
  0xe9   :  { %177 = vrot.lane.b32.xlu1 %v4148_v20, %s4052_s26  ;;  %173 = vrot.lane.b32.xlu0 %v4120_v11, %s4057_s3 }
  0xed   :  { %471 = vrot.lane.b32.xlu1 %v4158_v23, %s4052_s26  ;;  %477 = vrot.lane.b32.xlu0 %v4158_v23, %s4054_s28 }
  0xf1   :  { %474 = vrot.lane.b32.xlu1 %v4158_v23, %s4051_s25  ;;  %483 = vrot.lane.b32.xlu0 %v4158_v23, %s4056_s6 }
  0xf5   :  { %480 = vrot.lane.b32.xlu1 %v4158_v23, %s4053_s27  ;;  %489 = vrot.lane.b32.xlu0 %v4158_v23, %s4057_s3 }
  0xf9   :  { %486 = vrot.lane.b32.xlu1 %v4158_v23, %s4055_s5  ;;  %496 = vrot.lane.b32.xlu0 %v4177_v27, %s4051_s25 }
  0xfd   :  { %493 = vrot.lane.b32.xlu1 %v4177_v27, %s4052_s26  ;;  %502 = vrot.lane.b32.xlu0 %v4177_v27, %s4053_s27 }
 0x101   :  { %499 = vrot.lane.b32.xlu1 %v4177_v27, %s4054_s28  ;;  %508 = vrot.lane.b32.xlu0 %v4177_v27, %s4055_s5 }
 0x105   :  { %505 = vrot.lane.b32.xlu1 %v4177_v27, %s4056_s6  ;;  %180 = vrot.lane.b32.xlu0 %v4148_v20, %s4051_s25 }
 0x109   :  { %511 = vrot.lane.b32.xlu1 %v4177_v27, %s4057_s3  ;;  %186 = vrot.lane.b32.xlu0 %v4148_v20, %s4053_s27 }
 0x10d   :  { %183 = vrot.lane.b32.xlu1 %v4148_v20, %s4054_s28  ;;  %192 = vrot.lane.b32.xlu0 %v4148_v20, %s4055_s5 }
 0x111   :  { %189 = vrot.lane.b32.xlu1 %v4148_v20, %s4056_s6 }
 0x115   :  { %195 = vrot.lane.b32.xlu1 %v4148_v20, %s4057_s3 }
 0x14f   :  { %v159_v31 = vpop.permute.xlu1 %158  ;;  %v156_v32 = vpop.permute.xlu0 %155 }
 0x150   :  { %v199_v34 = vcombine.high %v4120_v11, %v159_v31  ;;  %v198_v47 = vcombine.low %v4120_v11, %v159_v31 }
 0x152   :  { %v4214_v38 = vrot.slane %v199_v34, %v4208_v33  ;;  %v4234_v54 = vrot.slane %v198_v47, %v4208_v33 }
 0x153   :  { %v4211_v35 = vpop.permute.xlu1 %164  ;;  %v162_v36 = vpop.permute.xlu0 %161 }
 0x154   :  { %v215_v37 = vcombine.high %v156_v32, %v162_v36  ;;  %v214_v42 = vcombine.low %v156_v32, %v162_v36 }
 0x156   :  { %v4217_v39 = vrot.slane %v215_v37, %v4208_v33  ;;  %v4227_v49 = vrot.slane %v214_v42, %v4208_v33 }
 0x157   :  { %v4219_v43 = vpop.permute.xlu1 %170  ;;  %v168_v44 = vpop.permute.xlu0 %167 }
 0x158   :  { %v278_v45 = vcombine.low %v4214_v38, %v4217_v39  ;;  %v279_v46 = vcombine.high %v4214_v38, %v4217_v39  ;;  %v230_v50 = vcombine.low %v4211_v35, %v4219_v43  ;;  %v262_v60 = vcombine.low %v4234_v54, %v4227_v49 }
 0x159   :  { %v263_v47 = vcombine.high %v4234_v54, %v4227_v49  ;;  %v231_v48 = vcombine.high %v4211_v35, %v4219_v43 }
 0x15a   :  { %v238_v57 = vrot.slane %v230_v50, %v4208_v33  ;;  %v270_v0 = vrot.slane %v262_v60, %v4238_v56 }
 0x15b   :  { %v4231_v51 = vpop.permute.xlu1 %177  ;;  %v174_v52 = vpop.permute.xlu0 %173 }
 0x15c   :  { %v246_v53 = vcombine.low %v168_v44, %v174_v52  ;;  %v247_v34 = vcombine.high %v168_v44, %v174_v52 }
 0x15e   :  { %v254_v55 = vrot.slane %v246_v53, %v4208_v33 }
 0x15f   :  { %v4241_v58 = vpop.permute.xlu1 %471  ;;  %v4243_v59 = vpop.permute.xlu0 %477 }
 0x160   :  { %v294_v61 = vcombine.low %v238_v57, %v254_v55  ;;  %v530_v21 = vcombine.low %v4241_v58, %v4243_v59  ;;  %v295_v36 = vcombine.high %v238_v57, %v254_v55  ;;  %v531_v60 = vcombine.high %v4241_v58, %v4243_v59 }
 0x162   :  { %v302_v1 = vrot.slane %v294_v61, %v4238_v56  ;;  %v538_v37 = vrot.slane %v530_v21, %v4208_v33 }
 0x163   :  { %v475_v62 = vpop.permute.xlu1 %474  ;;  %v4247_v63 = vpop.permute.xlu0 %483 }
 0x164   :  { %v326_v3 = vcombine.low %v270_v0, %v302_v1  ;;  %v327_v5 = vcombine.high %v270_v0, %v302_v1  ;;  %v514_v15 = vcombine.low %v4158_v23, %v475_v62  ;;  %v515_v40 = vcombine.high %v4158_v23, %v475_v62 }
 0x165   :  { %v4290_v23 = vrot.slane %v247_v34, %v4208_v33  ;;  %v4295_v0 = vrot.slane %v295_v36, %v4238_v56 }
 0x166   :  { %3792 = vmatprep.mubr.msk.f32.mxu1 %vm786_vm2, %v326_v3  ;;  %3799 = vmatprep.mubr.msk.f32.mxu0 %vm786_vm2, %v327_v5  ;;  %v522_v28 = vrot.slane %v514_v15, %v4208_v33  ;;  %v4298_v1 = vrot.slane %v515_v40, %v4208_v33 }
 0x167   :  { %v481_v6 = vpop.permute.xlu1 %480  ;;  %v4253_v10 = vpop.permute.xlu0 %489 }
 0x168   :  { %v562_v24 = vcombine.low %v4247_v63, %v4253_v10  ;;  %v578_v53 = vcombine.low %v522_v28, %v538_v37  ;;  %v579_v44 = vcombine.high %v522_v28, %v538_v37 }
 0x16a   :  { %v570_v41 = vrot.slane %v562_v24, %v4208_v33  ;;  %v593_v59 = vrot.slane %v579_v44, %v4238_v56 }
 0x16b   :  { %v487_v11 = vpop.permute.xlu1 %486  ;;  %v4255_v12 = vpop.permute.xlu0 %496 }
 0x16c   :  { %v546_v16 = vcombine.low %v481_v6, %v487_v11  ;;  %v650_v30 = vcombine.low %v4177_v27, %v4255_v12  ;;  %v547_v61 = vcombine.high %v481_v6, %v487_v11 }
 0x16e   :  { %v554_v29 = vrot.slane %v546_v16, %v4208_v33  ;;  %v658_v55 = vrot.slane %v650_v30, %v4208_v33  ;;  %v563_v16 = vcombine.high %v4247_v63, %v4253_v10  ;;  %v651_v63 = vcombine.high %v4177_v27, %v4255_v12 }
 0x16f   :  { %v4257_v13 = vpop.permute.xlu1 %493  ;;  %v4259_v14 = vpop.permute.xlu0 %502 }
 0x170   :  { %v610_v52 = vcombine.low %v554_v29, %v570_v41  ;;  %v611_v3 = vcombine.high %v554_v29, %v570_v41  ;;  %v4312_v29 = vrot.slane %v547_v61, %v4208_v33 }
 0x172   :  { %v618_v28 = vrot.slane %v610_v52, %v4238_v56  ;;  %v625_v34 = vrot.slane %v611_v3, %v4238_v56 }
 0x173   :  { %v4262_v17 = vpop.permute.xlu1 %499  ;;  %v4264_v18 = vpop.permute.xlu0 %508 }
 0x174   :  { %v666_v25 = vcombine.low %v4257_v13, %v4262_v17  ;;  %v682_v50 = vcombine.low %v4259_v14, %v4264_v18  ;;  %v667_v36 = vcombine.high %v4257_v13, %v4262_v17  ;;  %v683_v37 = vcombine.high %v4259_v14, %v4264_v18 }
 0x175   :  { %v644_v3 = vcombine.low %v593_v59, %v625_v34 }
 0x176   :  { %v674_v42 = vrot.slane %v666_v25, %v4208_v33  ;;  %v690_v24 = vrot.slane %v682_v50, %v4208_v33  ;;  %v586_v25 = vrot.slane %v578_v53, %v4238_v56  ;;  %v697_v61 = vrot.slane %v683_v37, %v4208_v33 }
 0x177   :  { %v506_v31 = vpop.permute.xlu1 %505  ;;  %v4276_v32 = vpop.permute.xlu0 %180 }
 0x178   :  { %v715_v5 = vcombine.high %v658_v55, %v674_v42  ;;  %v714_v21 = vcombine.low %v658_v55, %v674_v42  ;;  %v334_v12 = vcombine.low %v4148_v20, %v4276_v32  ;;  %v642_v14 = vcombine.low %v586_v25, %v618_v28 }
 0x179   :  { %v643_v18 = vcombine.high %v586_v25, %v618_v28  ;;  %v577_v25 = vrot.slane %v563_v16, %v4208_v33  ;;  %v665_v28 = vrot.slane %v651_v63, %v4208_v33  ;;  %v545_v16 = vrot.slane %v531_v60, %v4208_v33 }
 0x17a   :  { %v722_v42 = vrot.slane %v714_v21, %v4238_v56  ;;  %v4381_v60 = vrot.slane %v231_v48, %v4208_v33 }
 0x17b   :  { %v512_v57 = vpop.permute.xlu1 %511  ;;  %v4300_v15 = vpop.permute.xlu0 %186  ;;  %v626_v63 = vcombine.low %v4312_v29, %v577_v25 }
 0x17c   :  { %v698_v62 = vcombine.low %v506_v31, %v512_v57  ;;  %v699_v6 = vcombine.high %v506_v31, %v512_v57  ;;  %v729_v31 = vrot.slane %v715_v5, %v4238_v56  ;;  %v4337_v57 = vrot.slane %v667_v36, %v4208_v33 }
 0x17d   :  { %v645_v5 = vcombine.high %v593_v59, %v625_v34 }
 0x17e   :  { %v706_v58 = vrot.slane %v698_v62, %v4208_v33  ;;  %v4330_v50 = vrot.slane %v699_v6, %v4208_v33  ;;  %v730_v37 = vcombine.low %v665_v28, %v4337_v57 }
 0x17f   :  { %v4307_v11 = vpop.permute.xlu1 %183  ;;  %v4332_v13 = vpop.permute.xlu0 %192 }
 0x180   :  { %v746_v10 = vcombine.low %v690_v24, %v706_v58  ;;  %v747_v30 = vcombine.high %v690_v24, %v706_v58  ;;  %v350_v41 = vcombine.low %v4231_v51, %v4307_v11  ;;  %v366_v24 = vcombine.low %v4300_v15, %v4332_v13 }
 0x181   :  { %v763_v54 = vcombine.high %v697_v61, %v4330_v50 }
 0x182   :  { %v761_v40 = vrot.slane %v747_v30, %v4238_v56  ;;  %v754_v27 = vrot.slane %v746_v10, %v4238_v56  ;;  %v4347_v21 = vrot.slane %v350_v41, %v4208_v33  ;;  %v4354_v10 = vrot.slane %v334_v12, %v4208_v33 }
 0x183   :  { %v4334_v17 = vpop.permute.xlu1 %189  ;;  %v762_v30 = vcombine.low %v697_v61, %v4330_v50  ;;  %v374_v41 = vrot.slane %v366_v24, %v4208_v33  ;;  %v367_v50 = vcombine.high %v4300_v15, %v4332_v13  ;;  %v335_v61 = vcombine.high %v4148_v20, %v4276_v32 }
 0x184   :  { %v778_v53 = vcombine.low %v722_v42, %v754_v27  ;;  %v779_v44 = vcombine.high %v722_v42, %v754_v27  ;;  %v780_v52 = vcombine.low %v729_v31, %v761_v40  ;;  %v781_v55 = vcombine.high %v729_v31, %v761_v40 }
 0x185   :  { %v398_v40 = vcombine.low %v4354_v10, %v4347_v21  ;;  %v594_v27 = vcombine.low %v4298_v1, %v545_v16  ;;  %v770_v12 = vrot.slane %v762_v30, %v4238_v56  ;;  %v627_v30 = vcombine.high %v4312_v29, %v577_v25 }
 0x186   :  { %v3900_v58 = vpack.c.bf16 %v778_v53, %v642_v14  ;;  %v3906_v6 = vpack.c.bf16 %v779_v44, %v643_v18  ;;  %v3912_v34 = vpack.c.bf16 %v780_v52, %v644_v3  ;;  %v3918_v31 = vpack.c.bf16 %v781_v55, %v645_v5 }
 0x187   :  { %v196_v36 = vpop.permute.xlu1 %195  ;;  %v277_v14 = vrot.slane %v263_v47, %v4238_v56  ;;  %v310_v53 = vcombine.low %v4381_v60, %v4290_v23  ;;  %v634_v44 = vrot.slane %v626_v63, %v4238_v56  ;;  %v738_v52 = vrot.slane %v730_v37, %v4238_v56 }
 0x188   :  { %v382_v59 = vcombine.low %v4334_v17, %v196_v36  ;;  %3902 = vmatprep.subr.msk.bf16.mxu1 %vm4342_vm3, %v3900_v58  ;;  %3908 = vmatprep.subr.msk.bf16.mxu0 %vm4342_vm3, %v3906_v6  ;;  %v406_v35 = vrot.slane %v398_v40, %v4238_v56  ;;  %v595_v3 = vcombine.high %v4298_v1, %v545_v16 }
 0x189   :  { %3905 = vmatpush3.bf16.xpose.msk.msra.mxu1 %vm4342_vm3, %v3900_v58  ;;  %3911 = vmatpush3.bf16.xpose.msk.msra.mxu0 %vm4342_vm3, %v3906_v6  ;;  %v328_v48 = vcombine.low %v277_v14, %v4295_v0  ;;  %v329_v55 = vcombine.high %v277_v14, %v4295_v0  ;;  %v602_v49 = vrot.slane %v594_v27, %v4238_v56 }
 0x18a   :  { %v390_v42 = vrot.slane %v382_v59, %v4208_v33  ;;  %3914 = vmatprep.subr.msk.bf16.mxu1 %vm4342_vm3, %v3912_v34  ;;  %3920 = vmatprep.subr.msk.bf16.mxu0 %vm4342_vm3, %v3918_v31  ;;  %v782_v47 = vcombine.low %v738_v52, %v770_v12  ;;  %v383_v5 = vcombine.high %v4334_v17, %v196_v36 }
 0x18b   :  { %v783_v6 = vcombine.high %v738_v52, %v770_v12  ;;  %v731_v59 = vcombine.high %v665_v28, %v4337_v57  ;;  %v646_v37 = vcombine.low %v602_v49, %v634_v44  ;;  %v351_v0 = vcombine.high %v4231_v51, %v4307_v11 }
 0x18c   :  { %v430_v18 = vcombine.low %v374_v41, %v390_v42  ;;  %v431_v24 = vcombine.high %v374_v41, %v390_v42  ;;  %v399_v1 = vcombine.high %v4354_v10, %v4347_v21  ;;  %v647_v17 = vcombine.high %v602_v49, %v634_v44 }
 0x18d   :  { %v777_v29 = vrot.slane %v763_v54, %v4238_v56  ;;  %v3924_v51 = vpack.c.bf16 %v782_v47, %v646_v37  ;;  %v397_v11 = vrot.slane %v383_v5, %v4208_v33  ;;  %v641_v20 = vrot.slane %v627_v30, %v4238_v56 }
 0x18e   :  { %v438_v43 = vrot.slane %v430_v18, %v4238_v56  ;;  %v445_v57 = vrot.slane %v431_v24, %v4238_v56  ;;  %v3930_v15 = vpack.c.bf16 %v783_v6, %v647_v17  ;;  %v745_v32 = vrot.slane %v731_v59, %v4238_v56  ;;  %v4485_v6 = vpop.f32.mrb[4].mxu0 }
 0x18f   :  { %v318_v13 = vrot.slane %v310_v53, %v4238_v56  ;;  %v365_v21 = vrot.slane %v351_v0, %v4208_v33  ;;  %v413_v25 = vrot.slane %v399_v1, %v4238_v56  ;;  %v381_v28 = vrot.slane %v367_v50, %v4208_v33  ;;  %v4487_v30 = vpop.f32.mrb[5].mxu0 }
 0x190   :  { %v463_v58 = vcombine.high %v406_v35, %v438_v43  ;;  %v462_v63 = vcombine.low %v406_v35, %v438_v43  ;;  %v286_v10 = vrot.slane %v278_v45, %v4238_v56  ;;  %v609_v36 = vrot.slane %v595_v3, %v4238_v56  ;;  %v3686_v43 = vld [vmem:[%s5034_s0 + $0x8] sm:$0xff] }
 0x191   :  { %v446_v16 = vcombine.low %v381_v28, %v397_v11  ;;  %v465_v40 = vcombine.high %v413_v25, %v445_v57  ;;  %v785_v41 = vcombine.high %v745_v32, %v777_v29  ;;  %v464_v42 = vcombine.low %v413_v25, %v445_v57 }
 0x192   :  { %3800 = vmatmul.mubr.msk.f32.vlgmr.msra.gmra.mrb[6].mxu0 %vm786_vm2, %v463_v58  ;;  %3793 = vmatmul.mubr.msk.f32.vlgmr.msra.gmra.mrb[0].mxu1 %vm786_vm2, %v462_v63  ;;  %v648_v27 = vcombine.low %v609_v36, %v641_v20  ;;  %v311_v12 = vcombine.high %v4381_v60, %v4290_v23  ;;  %v330_v18 = vcombine.low %v286_v10, %v318_v13 }
 0x193   :  { %3923 = vmatpush3.bf16.xpose.msk.msra.mxu0 %vm4342_vm3, %v3918_v31  ;;  %3917 = vmatpush3.bf16.xpose.msk.msra.mxu1 %vm4342_vm3, %v3912_v34  ;;  %v784_v34 = vcombine.low %v745_v32, %v777_v29  ;;  %v349_v31 = vrot.slane %v335_v61, %v4208_v33  ;;  %v649_v53 = vcombine.high %v609_v36, %v641_v20 }
 0x194   :  { %3806 = vmatprep.mubr.msk.f32.mxu1 %vm786_vm2, %v328_v48  ;;  %3813 = vmatprep.mubr.msk.f32.mxu0 %vm786_vm2, %v329_v55  ;;  %v331_v45 = vcombine.high %v286_v10, %v318_v13  ;;  %v454_v52 = vrot.slane %v446_v16, %v4238_v56  ;;  %v325_v60 = vrot.slane %v311_v12, %v4238_v56 }
 0x195   :  { %3926 = vmatprep.subr.msk.bf16.mxu1 %vm4342_vm3, %v3924_v51  ;;  %3932 = vmatprep.subr.msk.bf16.mxu0 %vm4342_vm3, %v3930_v15  ;;  %v414_v14 = vcombine.low %v349_v31, %v365_v21  ;;  %v3936_v44 = vpack.c.bf16 %v784_v34, %v648_v27  ;;  %v3942_v23 = vpack.c.bf16 %v785_v41, %v649_v53 }
 0x196   :  { %v293_v48 = vrot.slane %v279_v46, %v4238_v56  ;;  %v447_v55 = vcombine.high %v381_v28, %v397_v11  ;;  %v1853_v54 = vcombine.high %v3686_v43, %v3686_v43  ;;  %v415_v47 = vcombine.high %v349_v31, %v365_v21 }
 0x197   :  { %v422_v35 = vrot.slane %v414_v14, %v4238_v56 }
 0x198   :  { %v332_v5 = vcombine.low %v293_v48, %v325_v60  ;;  %v333_v24 = vcombine.high %v293_v48, %v325_v60  ;;  %v461_v58 = vrot.slane %v447_v55, %v4238_v56  ;;  %v429_v38 = vrot.slane %v415_v47, %v4238_v56 }
 0x199   :  { %v467_v3 = vcombine.high %v422_v35, %v454_v52  ;;  %v466_v49 = vcombine.low %v422_v35, %v454_v52 }
 0x19a   :  { %3814 = vmatmul.mubr.msk.f32.vlgmr.msra.gmra.mrb[8].mxu0 %vm786_vm2, %v465_v40  ;;  %3807 = vmatmul.mubr.msk.f32.vlgmr.msra.gmra.mrb[2].mxu1 %vm786_vm2, %v464_v42  ;;  %v469_v39 = vcombine.high %v429_v38, %v461_v58  ;;  %v468_v46 = vcombine.low %v429_v38, %v461_v58 }
 0x19b   :  { %3935 = vmatpush3.bf16.xpose.msk.msra.mxu0 %vm4342_vm3, %v3930_v15  ;;  %3929 = vmatpush3.bf16.xpose.msk.msra.mxu1 %vm4342_vm3, %v3924_v51 }
 0x19c   :  { %3820 = vmatprep.mubr.msk.f32.mxu1 %vm786_vm2, %v330_v18  ;;  %3827 = vmatprep.mubr.msk.f32.mxu0 %vm786_vm2, %v331_v45 }
 0x19d   :  { %3938 = vmatprep.subr.msk.bf16.mxu1 %vm4342_vm3, %v3936_v44  ;;  %3944 = vmatprep.subr.msk.bf16.mxu0 %vm4342_vm3, %v3942_v23 }
 0x1a2   :  { %3828 = vmatmul.mubr.msk.f32.vlgmr.msra.gmra.mrb[10].mxu0 %vm786_vm2, %v467_v3  ;;  %3821 = vmatmul.mubr.msk.f32.vlgmr.msra.gmra.mrb[4].mxu1 %vm786_vm2, %v466_v49 }
 0x1a3   :  { %3947 = vmatpush3.bf16.xpose.msk.msra.mxu0 %vm4342_vm3, %v3942_v23  ;;  %3941 = vmatpush3.bf16.xpose.msk.msra.mxu1 %vm4342_vm3, %v3936_v44 }
 0x1a4   :  { %3834 = vmatprep.mubr.msk.f32.mxu1 %vm786_vm2, %v332_v5  ;;  %3841 = vmatprep.mubr.msk.f32.mxu0 %vm786_vm2, %v333_v24 }
 0x1a5   :  { %3687 = vmatprep.subr.msk.mxu1 %vm53_vm0, %v1853_v54 }
 0x1aa   :  { %3842 = vmatmul.mubr.msk.f32.vlgmr.msra.gmra.mrb[12].mxu0 %vm786_vm2, %v469_v39  ;;  %3835 = vmatmul.mubr.msk.f32.vlgmr.msra.gmra.mrb[6].mxu1 %vm786_vm2, %v468_v46 }
 0x1ab   :  { %3688 = vmatpush1.msk.msra.mxu1 %vm53_vm0, %v3686_v43  ;;  %1922 = vmatprep.mubr.f32.mxu1 %v4049_v2 }
 0x1ae   :  { %3689 = vmatmul.mubr.msk.f32.vlgmr.msra.gmra.mrb[8].mxu1 %vm43_vm1, %v4097_v4 }
 0x1af   :  { %1928 = vmatprep.mubr.f32.mxu1 %v4049_v2 }
 0x1b2   :  { %3690 = vmatmul.mubr.msk.f32.gmra.mrb[10].mxu1 %vm43_vm1, %v4110_v7 }
 0x1b3   :  { %1934 = vmatprep.mubr.f32.mxu1 %v4049_v2 }
 0x1b6   :  { %3691 = vmatmul.mubr.msk.f32.gmra.mrb[12].mxu1 %vm43_vm1, %v4143_v19 }
 0x265   :  { %v3801_v59 = vpop.f32.mrb[6].mxu0  ;;  %v3794_v63 = vpop.f32.mrb[0].mxu1 }
 0x266   :  { %v952_v37 = vpop.f32.mrb[7].mxu0  ;;  %v865_v0 = vpop.f32.mrb[1].mxu1 }
 0x26d   :  { %v3815_v1 = vpop.f32.mrb[8].mxu0  ;;  %v3808_v4 = vpop.f32.mrb[2].mxu1 }
 0x26e   :  { %v1635_v50 = vcombine.low %v3801_v59, %v3815_v1  ;;  %v1636_v17 = vcombine.high %v3801_v59, %v3815_v1  ;;  %v1126_v61 = vpop.f32.mrb[9].mxu0  ;;  %v1619_v29 = vcombine.low %v3794_v63, %v3808_v4  ;;  %v1620_v7 = vcombine.high %v3794_v63, %v3808_v4  ;;  %v1039_v51 = vpop.f32.mrb[3].mxu1 }
 0x26f   :  { %v1499_v2 = vcombine.low %v952_v37, %v1126_v61  ;;  %v1500_v11 = vcombine.high %v952_v37, %v1126_v61  ;;  %v1483_v15 = vcombine.low %v865_v0, %v1039_v51  ;;  %v1484_v20 = vcombine.high %v865_v0, %v1039_v51 }
 0x270   :  { %v1643_v19 = vrot.slane %v1635_v50, %v4208_v33  ;;  %v4491_v57 = vrot.slane %v1636_v17, %v4208_v33  ;;  %v1627_v32 = vrot.slane %v1619_v29, %v4208_v33  ;;  %v4495_v13 = vrot.slane %v1620_v7, %v4208_v33 }
 0x271   :  { %v1507_v21 = vrot.slane %v1499_v2, %v4208_v33  ;;  %v4499_v25 = vrot.slane %v1500_v11, %v4208_v33  ;;  %v1491_v28 = vrot.slane %v1483_v15, %v4208_v33  ;;  %v4503_v10 = vrot.slane %v1484_v20, %v4208_v33 }
 0x272   :  { %v1683_v36 = vcombine.low %v1627_v32, %v1643_v19  ;;  %v1684_v34 = vcombine.high %v1627_v32, %v1643_v19  ;;  %v1699_v31 = vcombine.low %v4495_v13, %v4491_v57  ;;  %v1700_v16 = vcombine.high %v4495_v13, %v4491_v57 }
 0x273   :  { %v1547_v40 = vcombine.low %v1491_v28, %v1507_v21  ;;  %v1548_v41 = vcombine.high %v1491_v28, %v1507_v21  ;;  %v1563_v42 = vcombine.low %v4503_v10, %v4499_v25  ;;  %v1564_v27 = vcombine.high %v4503_v10, %v4499_v25 }
 0x274   :  { %v4514_v35 = vrot.slane %v1683_v36, %v4238_v56  ;;  %v4517_v43 = vrot.slane %v1684_v34, %v4238_v56  ;;  %v4531_v4 = vrot.slane %v1699_v31, %v4238_v56 }
 0x275   :  { %v3829_v12 = vpop.f32.mrb[10].mxu0  ;;  %v3822_v14 = vpop.f32.mrb[4].mxu1  ;;  %v4528_v1 = vrot.slane %v1547_v40, %v4238_v56  ;;  %v4543_v21 = vrot.slane %v1548_v41, %v4238_v56 }
 0x276   :  { %v1300_v18 = vpop.f32.mrb[11].mxu0  ;;  %v1213_v53 = vpop.f32.mrb[5].mxu1 }
 0x27d   :  { %v3843_v45 = vpop.f32.mrb[12].mxu0  ;;  %v3836_v44 = vpop.f32.mrb[6].mxu1 }
 0x27e   :  { %v1667_v52 = vcombine.low %v3829_v12, %v3843_v45  ;;  %v1668_v23 = vcombine.high %v3829_v12, %v3843_v45  ;;  %v1474_v60 = vpop.f32.mrb[13].mxu0  ;;  %v1651_v48 = vcombine.low %v3822_v14, %v3836_v44  ;;  %v1652_v55 = vcombine.high %v3822_v14, %v3836_v44  ;;  %v1387_v3 = vpop.f32.mrb[7].mxu1 }
 0x27f   :  { %v1531_v49 = vcombine.low %v1300_v18, %v1474_v60  ;;  %v1532_v54 = vcombine.high %v1300_v18, %v1474_v60  ;;  %v1515_v24 = vcombine.low %v1213_v53, %v1387_v3  ;;  %v1516_v58 = vcombine.high %v1213_v53, %v1387_v3 }
 0x280   :  { %v1675_v47 = vrot.slane %v1667_v52, %v4208_v33  ;;  %v1682_v5 = vrot.slane %v1668_v23, %v4208_v33  ;;  %v1659_v38 = vrot.slane %v1651_v48, %v4208_v33  ;;  %v1666_v39 = vrot.slane %v1652_v55, %v4208_v33 }
 0x281   :  { %v1539_v46 = vrot.slane %v1531_v49, %v4208_v33  ;;  %v1546_v59 = vrot.slane %v1532_v54, %v4208_v33  ;;  %v1523_v63 = vrot.slane %v1515_v24, %v4208_v33  ;;  %v1530_v37 = vrot.slane %v1516_v58, %v4208_v33  ;;  %v1924_v0 = vpop.f32.mrb[8].mxu1 }
 0x282   :  { %v1715_v50 = vcombine.low %v1659_v38, %v1675_v47  ;;  %v1716_v17 = vcombine.high %v1659_v38, %v1675_v47  ;;  %v1731_v61 = vcombine.low %v1666_v39, %v1682_v5  ;;  %v1732_v29 = vcombine.high %v1666_v39, %v1682_v5  ;;  %v1926_v7 = vpop.f32.mrb[9].mxu1 }
 0x283   :  { %v1579_v51 = vcombine.low %v1523_v63, %v1539_v46  ;;  %v1580_v2 = vcombine.high %v1523_v63, %v1539_v46  ;;  %v1595_v11 = vcombine.low %v1530_v37, %v1546_v59  ;;  %v1596_v19 = vcombine.high %v1530_v37, %v1546_v59 }
 0x284   :  { %v4534_v15 = vadd.f32 %v1924_v0, %v4117_v9  ;;  %v4537_v20 = vrot.slane %v1715_v50, %v4238_v56  ;;  %v4540_v32 = vrot.slane %v1716_v17, %v4238_v56  ;;  %v4552_v31 = vrot.slane %v1731_v61, %v4238_v56 }
 0x285   :  { %v1930_v28 = vpop.f32.mrb[10].mxu1  ;;  %v4546_v36 = vrot.slane %v1579_v51, %v4238_v56  ;;  %v4549_v34 = vrot.slane %v1580_v2, %v4238_v56  ;;  %v4555_v40 = vrot.slane %v1595_v11, %v4238_v56  ;;  %v1571_v18 = vrot.slane %v1563_v42, %v4238_v56 }
 0x286   :  { %1947 = vrot.lane.b32.xlu1 %v4534_v15, %s4051_s25  ;;  %1944 = vrot.lane.b32.xlu0 %v4534_v15, %s4052_s26  ;;  %v1932_v41 = vpop.f32.mrb[11].mxu1  ;;  %v1748_v12 = vcombine.high %v4514_v35, %v4537_v20  ;;  %v1749_v14 = vcombine.low %v4517_v43, %v4540_v32  ;;  %v1750_v44 = vcombine.high %v4517_v43, %v4540_v32 }
 0x287   :  { %v1612_v53 = vcombine.high %v4528_v1, %v4546_v36  ;;  %v1613_v45 = vcombine.low %v4543_v21, %v4549_v34  ;;  %v1614_v52 = vcombine.high %v4543_v21, %v4549_v34  ;;  %v1751_v23 = vcombine.low %v4531_v4, %v4552_v31 }
 0x288   :  { %v1615_v60 = vcombine.low %v1571_v18, %v4555_v40  ;;  %v1714_v42 = vrot.slane %v1700_v16, %v4238_v56  ;;  %v1752_v48 = vcombine.high %v4531_v4, %v4552_v31  ;;  %v1616_v55 = vcombine.high %v1571_v18, %v4555_v40 }
 0x289   :  { %v1746_v43 = vrot.slane %v1732_v29, %v4238_v56  ;;  %v1578_v3 = vrot.slane %v1564_v27, %v4238_v56  ;;  %v1610_v57 = vrot.slane %v1596_v19, %v4238_v56  ;;  %v1747_v13 = vcombine.low %v4514_v35, %v4537_v20 }
 0x28a   :  { %1953 = vrot.lane.b32.xlu1 %v4534_v15, %s4053_s27  ;;  %1950 = vrot.lane.b32.xlu0 %v4534_v15, %s4054_s28  ;;  %v1611_v16 = vcombine.low %v4528_v1, %v4546_v36  ;;  %v4603_v25 = vadd.f32 %v1926_v7, %v4117_v9  ;;  %v1931_v10 = vadd.f32 %v1930_v28, %v4115_v8 }
 0x28b   :  { %v1753_v49 = vcombine.low %v1714_v42, %v1746_v43  ;;  %v1754_v54 = vcombine.high %v1714_v42, %v1746_v43  ;;  %v1617_v47 = vcombine.low %v1578_v3, %v1610_v57  ;;  %v1618_v5 = vcombine.high %v1578_v3, %v1610_v57 }
 0x28c   :  { %v4611_v27 = vadd.f32 %v1931_v10, %v4151_v22  ;;  %v1933_v9 = vadd.f32 %v1932_v41, %v4115_v8  ;;  %v4667_v8 = vpop.f32.mrb[12].mxu1 }
 0x28e   :  { %1959 = vrot.lane.b32.xlu1 %v4534_v15, %s4055_s5  ;;  %1956 = vrot.lane.b32.xlu0 %v4534_v15, %s4056_s6  ;;  %v4627_v22 = vadd.f32 %v1933_v9, %v4170_v26  ;;  %v4669_v26 = vpop.f32.mrb[13].mxu1 }
 0x292   :  { %1966 = vrot.lane.b32.xlu1 %v4603_v25, %s4052_s26  ;;  %1962 = vrot.lane.b32.xlu0 %v4534_v15, %s4057_s3 }
 0x296   :  { %2263 = vrot.lane.b32.xlu1 %v4611_v27, %s4051_s25  ;;  %2260 = vrot.lane.b32.xlu0 %v4611_v27, %s4052_s26 }
 0x29a   :  { %2269 = vrot.lane.b32.xlu1 %v4611_v27, %s4053_s27  ;;  %2266 = vrot.lane.b32.xlu0 %v4611_v27, %s4054_s28 }
 0x29e   :  { %2275 = vrot.lane.b32.xlu1 %v4611_v27, %s4055_s5  ;;  %2272 = vrot.lane.b32.xlu0 %v4611_v27, %s4056_s6 }
 0x2a2   :  { %2282 = vrot.lane.b32.xlu1 %v4627_v22, %s4052_s26  ;;  %2278 = vrot.lane.b32.xlu0 %v4611_v27, %s4057_s3 }
 0x2a6   :  { %2288 = vrot.lane.b32.xlu1 %v4627_v22, %s4054_s28  ;;  %2285 = vrot.lane.b32.xlu0 %v4627_v22, %s4051_s25 }
 0x2aa   :  { %2294 = vrot.lane.b32.xlu1 %v4627_v22, %s4056_s6  ;;  %2291 = vrot.lane.b32.xlu0 %v4627_v22, %s4053_s27 }
 0x2ae   :  { %2300 = vrot.lane.b32.xlu1 %v4627_v22, %s4057_s3  ;;  %2297 = vrot.lane.b32.xlu0 %v4627_v22, %s4055_s5 }
 0x2b2   :  { %1972 = vrot.lane.b32.xlu1 %v4603_v25, %s4054_s28  ;;  %1969 = vrot.lane.b32.xlu0 %v4603_v25, %s4051_s25 }
 0x2b6   :  { %1978 = vrot.lane.b32.xlu1 %v4603_v25, %s4056_s6  ;;  %1975 = vrot.lane.b32.xlu0 %v4603_v25, %s4053_s27 }
 0x2ba   :  { %1984 = vrot.lane.b32.xlu1 %v4603_v25, %s4057_s3  ;;  %1981 = vrot.lane.b32.xlu0 %v4603_v25, %s4055_s5 }
 0x2be   :  { %1784 = vrot.lane.b32.xlu1 %v1748_v12, %s4057_s3  ;;  %1756 = vrot.lane.b32.xlu0 %v1612_v53, %s4057_s3 }
 0x2c2   :  { %1788 = vrot.lane.b32.xlu1 %v1749_v14, %s4055_s5  ;;  %1760 = vrot.lane.b32.xlu0 %v1613_v45, %s4055_s5 }
 0x2c6   :  { %1792 = vrot.lane.b32.xlu1 %v1750_v44, %s4056_s6  ;;  %1764 = vrot.lane.b32.xlu0 %v1614_v52, %s4056_s6 }
 0x2ca   :  { %1796 = vrot.lane.b32.xlu1 %v1751_v23, %s4053_s27  ;;  %1768 = vrot.lane.b32.xlu0 %v1615_v60, %s4053_s27 }
 0x2ce   :  { %1800 = vrot.lane.b32.xlu1 %v1752_v48, %s4054_s28  ;;  %1772 = vrot.lane.b32.xlu0 %v1616_v55, %s4054_s28 }
 0x2d2   :  { %1804 = vrot.lane.b32.xlu1 %v1753_v49, %s4051_s25  ;;  %1776 = vrot.lane.b32.xlu0 %v1617_v47, %s4051_s25 }
 0x2d6   :  { %1808 = vrot.lane.b32.xlu1 %v1754_v54, %s4052_s26  ;;  %1780 = vrot.lane.b32.xlu0 %v1618_v5, %s4052_s26 }
 0x2f8   :  { %v1948_v24 = vpop.permute.xlu1 %1947  ;;  %v1945_v58 = vpop.permute.xlu0 %1944 }
 0x2f9   :  { %v1987_v37 = vcombine.low %v4534_v15, %v1948_v24  ;;  %v1988_v42 = vcombine.high %v4534_v15, %v1948_v24 }
 0x2fb   :  { %v4682_v61 = vrot.slane %v1987_v37, %v4208_v33  ;;  %v4717_v15 = vrot.slane %v1988_v42, %v4208_v33 }
 0x2fc   :  { %v1954_v38 = vpop.permute.xlu1 %1953  ;;  %v1951_v39 = vpop.permute.xlu0 %1950 }
 0x2fd   :  { %v2003_v46 = vcombine.low %v1945_v58, %v1951_v39  ;;  %v2004_v43 = vcombine.high %v1945_v58, %v1951_v39 }
 0x2ff   :  { %v4677_v0 = vrot.slane %v2003_v46, %v4208_v33  ;;  %v4722_v58 = vrot.slane %v2004_v43, %v4208_v33 }
 0x300   :  { %v1960_v59 = vpop.permute.xlu1 %1959  ;;  %v1957_v63 = vpop.permute.xlu0 %1956 }
 0x301   :  { %v2019_v4 = vcombine.low %v1954_v38, %v1960_v59  ;;  %v2051_v7 = vcombine.low %v4682_v61, %v4677_v0  ;;  %v2020_v49 = vcombine.high %v1954_v38, %v1960_v59 }
 0x303   :  { %v4687_v51 = vrot.slane %v2019_v4, %v4208_v33  ;;  %v2059_v21 = vrot.slane %v2051_v7, %v4238_v56  ;;  %v4728_v4 = vrot.slane %v2020_v49, %v4208_v33 }
 0x304   :  { %v4679_v50 = vpop.permute.xlu1 %1966  ;;  %v1963_v17 = vpop.permute.xlu0 %1962 }
 0x305   :  { %v2035_v29 = vcombine.low %v1957_v63, %v1963_v17  ;;  %v2036_v54 = vcombine.high %v1957_v63, %v1963_v17  ;;  %v2052_v63 = vcombine.high %v4682_v61, %v4677_v0 }
 0x307   :  { %v4690_v2 = vrot.slane %v2035_v29, %v4208_v33  ;;  %v4731_v17 = vrot.slane %v2036_v54, %v4208_v33 }
 0x308   :  { %v4692_v11 = vpop.permute.xlu1 %2263  ;;  %v2261_v19 = vpop.permute.xlu0 %2260 }
 0x309   :  { %v2083_v32 = vcombine.low %v4687_v51, %v4690_v2  ;;  %v2303_v23 = vcombine.low %v4611_v27, %v4692_v11  ;;  %v2084_v29 = vcombine.high %v4687_v51, %v4690_v2 }
 0x30b   :  { %v2091_v28 = vrot.slane %v2083_v32, %v4238_v56  ;;  %v2311_v10 = vrot.slane %v2303_v23, %v4208_v33 }
 0x30c   :  { %v2270_v34 = vpop.permute.xlu1 %2269  ;;  %v2267_v31 = vpop.permute.xlu0 %2266 }
 0x30d   :  { %v2115_v40 = vcombine.low %v2059_v21, %v2091_v28  ;;  %v2116_v41 = vcombine.high %v2059_v21, %v2091_v28  ;;  %v2319_v45 = vcombine.low %v2261_v19, %v2267_v31  ;;  %v2320_v24 = vcombine.high %v2261_v19, %v2267_v31 }
 0x30f   :  { %3848 = vmatprep.mubr.msk.f32.mxu0 %vm786_vm2, %v2115_v40  ;;  %3855 = vmatprep.mubr.msk.f32.mxu1 %vm786_vm2, %v2116_v41  ;;  %v2327_v3 = vrot.slane %v2319_v45, %v4208_v33  ;;  %v2304_v40 = vcombine.high %v4611_v27, %v4692_v11  ;;  %v4738_v41 = vrot.slane %v2320_v24, %v4208_v33 }
 0x310   :  { %v2276_v12 = vpop.permute.xlu1 %2275  ;;  %v2273_v14 = vpop.permute.xlu0 %2272 }
 0x311   :  { %v2335_v57 = vcombine.low %v2270_v34, %v2276_v12  ;;  %v2367_v39 = vcombine.low %v2311_v10, %v2327_v3  ;;  %v2368_v38 = vcombine.high %v2311_v10, %v2327_v3  ;;  %v2336_v32 = vcombine.high %v2270_v34, %v2276_v12 }
 0x313   :  { %v2343_v59 = vrot.slane %v2335_v57, %v4208_v33  ;;  %v2382_v42 = vrot.slane %v2368_v38, %v4238_v56  ;;  %v4749_v11 = vrot.slane %v2336_v32, %v4208_v33 }
 0x314   :  { %v4700_v18 = vpop.permute.xlu1 %2282  ;;  %v2279_v53 = vpop.permute.xlu0 %2278 }
 0x315   :  { %v2351_v60 = vcombine.low %v2273_v14, %v2279_v53  ;;  %v2352_v45 = vcombine.high %v2273_v14, %v2279_v53 }
 0x317   :  { %v2359_v9 = vrot.slane %v2351_v60, %v4208_v33  ;;  %v2375_v60 = vrot.slane %v2367_v39, %v4238_v56  ;;  %v4753_v57 = vrot.slane %v2352_v45, %v4208_v33 }
 0x318   :  { %v4702_v44 = vpop.permute.xlu1 %2288  ;;  %v4704_v52 = vpop.permute.xlu0 %2285 }
 0x319   :  { %v2455_v48 = vcombine.low %v4700_v18, %v4702_v44  ;;  %v2439_v55 = vcombine.low %v4627_v22, %v4704_v52  ;;  %v2399_v21 = vcombine.low %v2343_v59, %v2359_v9  ;;  %v2400_v34 = vcombine.high %v2343_v59, %v2359_v9 }
 0x31a   :  { %v2456_v49 = vcombine.high %v4700_v18, %v4702_v44  ;;  %v2440_v54 = vcombine.high %v4627_v22, %v4704_v52 }
 0x31b   :  { %v2463_v46 = vrot.slane %v2455_v48, %v4208_v33  ;;  %v2447_v37 = vrot.slane %v2439_v55, %v4208_v33  ;;  %v2407_v14 = vrot.slane %v2399_v21, %v4238_v56 }
 0x31c   :  { %v2295_v47 = vpop.permute.xlu1 %2294  ;;  %v2292_v5 = vpop.permute.xlu0 %2291  ;;  %v4782_v32 = vrot.slane %v2440_v54, %v4208_v33 }
 0x31d   :  { %v2503_v23 = vcombine.low %v2447_v37, %v2463_v46  ;;  %v2504_v12 = vcombine.high %v2447_v37, %v2463_v46  ;;  %v2414_v46 = vrot.slane %v2400_v34, %v4238_v56  ;;  %v2431_v39 = vcombine.low %v2375_v60, %v2407_v14 }
 0x31e   :  { %v2432_v59 = vcombine.high %v2375_v60, %v2407_v14  ;;  %v4796_v14 = vrot.slane %v2304_v40, %v4208_v33 }
 0x31f   :  { %v2518_v37 = vrot.slane %v2504_v12, %v4238_v56 }
 0x320   :  { %v2301_v7 = vpop.permute.xlu1 %2300  ;;  %v2298_v19 = vpop.permute.xlu0 %2297  ;;  %v2383_v54 = vcombine.low %v4796_v14, %v4738_v41 }
 0x321   :  { %v2487_v28 = vcombine.low %v2295_v47, %v2301_v7  ;;  %v2471_v31 = vcombine.low %v2292_v5, %v2298_v19  ;;  %v2488_v48 = vcombine.high %v2295_v47, %v2301_v7  ;;  %v2472_v55 = vcombine.high %v2292_v5, %v2298_v19 }
 0x322   :  { %v2511_v47 = vrot.slane %v2503_v23, %v4238_v56  ;;  %v4779_v19 = vrot.slane %v2456_v49, %v4208_v33 }
 0x323   :  { %v2495_v51 = vrot.slane %v2487_v28, %v4208_v33  ;;  %v2479_v2 = vrot.slane %v2471_v31, %v4208_v33  ;;  %v4769_v18 = vrot.slane %v2488_v48, %v4208_v33  ;;  %v4772_v22 = vrot.slane %v2472_v55, %v4208_v33 }
 0x324   :  { %v4744_v43 = vpop.permute.xlu1 %1972  ;;  %v4746_v27 = vpop.permute.xlu0 %1969  ;;  %v2433_v48 = vcombine.low %v2382_v42, %v2414_v46  ;;  %v2434_v55 = vcombine.high %v2382_v42, %v2414_v46  ;;  %v2067_v46 = vcombine.low %v4717_v15, %v4722_v58 }
 0x325   :  { %v2535_v53 = vcombine.low %v2479_v2, %v2495_v51  ;;  %v2536_v3 = vcombine.high %v2479_v2, %v2495_v51  ;;  %v2139_v9 = vcombine.low %v4679_v50, %v4744_v43  ;;  %v2123_v24 = vcombine.low %v4603_v25, %v4746_v27 }
 0x326   :  { %v4791_v2 = vrot.slane %v2084_v29, %v4238_v56  ;;  %v2551_v60 = vcombine.low %v4772_v22, %v4769_v18  ;;  %v2519_v29 = vcombine.low %v4782_v32, %v4779_v19 }
 0x327   :  { %v2543_v5 = vrot.slane %v2535_v53, %v4238_v56  ;;  %v2550_v10 = vrot.slane %v2536_v3, %v4238_v56  ;;  %v4785_v31 = vrot.slane %v2139_v9, %v4208_v33  ;;  %v4788_v45 = vrot.slane %v2123_v24, %v4208_v33 }
 0x328   :  { %v4774_v44 = vpop.permute.xlu1 %1978  ;;  %v4776_v52 = vpop.permute.xlu0 %1975  ;;  %v2415_v53 = vcombine.low %v4749_v11, %v4753_v57  ;;  %v2066_v9 = vrot.slane %v2052_v63, %v4238_v56  ;;  %v2559_v24 = vrot.slane %v2551_v60, %v4238_v56  ;;  %v2527_v0 = vrot.slane %v2519_v29, %v4238_v56 }
 0x329   :  { %v2567_v38 = vcombine.low %v2511_v47, %v2543_v5  ;;  %v2568_v7 = vcombine.high %v2511_v47, %v2543_v5  ;;  %v2569_v21 = vcombine.low %v2518_v37, %v2550_v10  ;;  %v2570_v28 = vcombine.high %v2518_v37, %v2550_v10 }
 0x32a   :  { %v2187_v47 = vcombine.low %v4788_v45, %v4785_v31  ;;  %v2099_v37 = vcombine.low %v4728_v4, %v4731_v17  ;;  %v2117_v61 = vcombine.low %v2066_v9, %v4791_v2  ;;  %v2118_v63 = vcombine.high %v2066_v9, %v4791_v2 }
 0x32b   :  { %v3948_v23 = vpack.c.bf16 %v2567_v38, %v2431_v39  ;;  %v3954_v51 = vpack.c.bf16 %v2568_v7, %v2432_v59  ;;  %v3960_v40 = vpack.c.bf16 %v2569_v21, %v2433_v48  ;;  %v3966_v42 = vpack.c.bf16 %v2570_v28, %v2434_v55 }
 0x32c   :  { %v1985_v34 = vpop.permute.xlu1 %1984  ;;  %v1982_v12 = vpop.permute.xlu0 %1981  ;;  %v2423_v38 = vrot.slane %v2415_v53, %v4238_v56  ;;  %v2384_v59 = vcombine.high %v4796_v14, %v4738_v41  ;;  %v2391_v7 = vrot.slane %v2383_v54, %v4238_v56  ;;  %v2195_v21 = vrot.slane %v2187_v47, %v4238_v56 }
 0x32d   :  { %v2171_v3 = vcombine.low %v4774_v44, %v1985_v34  ;;  %v2155_v49 = vcombine.low %v4776_v52, %v1982_v12  ;;  %3950 = vmatprep.subr.msk.bf16.mxu0 %vm4342_vm3, %v3948_v23  ;;  %3956 = vmatprep.subr.msk.bf16.mxu1 %vm4342_vm3, %v3954_v51  ;;  %v2571_v60 = vcombine.low %v2527_v0, %v2559_v24 }
 0x32e   :  { %3953 = vmatpush3.bf16.xpose.msk.msra.mxu0 %vm4342_vm3, %v3948_v23  ;;  %3959 = vmatpush3.bf16.xpose.msk.msra.mxu1 %vm4342_vm3, %v3954_v51  ;;  %v2552_v23 = vcombine.high %v4772_v22, %v4769_v18  ;;  %v2172_v51 = vcombine.high %v4774_v44, %v1985_v34  ;;  %v2572_v48 = vcombine.high %v2527_v0, %v2559_v24 }
 0x32f   :  { %v2179_v5 = vrot.slane %v2171_v3, %v4208_v33  ;;  %v2163_v10 = vrot.slane %v2155_v49, %v4208_v33  ;;  %3962 = vmatprep.subr.msk.bf16.mxu0 %vm4342_vm3, %v3960_v40  ;;  %3968 = vmatprep.subr.msk.bf16.mxu1 %vm4342_vm3, %v3966_v42  ;;  %v2156_v55 = vcombine.high %v4776_v52, %v1982_v12 }
 0x330   :  { %v2416_v41 = vcombine.high %v4749_v11, %v4753_v57  ;;  %v2520_v14 = vcombine.high %v4782_v32, %v4779_v19  ;;  %v2435_v49 = vcombine.low %v2391_v7, %v2423_v38  ;;  %v2436_v29 = vcombine.high %v2391_v7, %v2423_v38 }
 0x331   :  { %v2219_v39 = vcombine.low %v2163_v10, %v2179_v5  ;;  %v2220_v53 = vcombine.high %v2163_v10, %v2179_v5  ;;  %v2140_v18 = vcombine.high %v4679_v50, %v4744_v43  ;;  %v2124_v22 = vcombine.high %v4603_v25, %v4746_v27 }
 0x332   :  { %v2188_v44 = vcombine.high %v4788_v45, %v4785_v31  ;;  %v2566_v11 = vrot.slane %v2552_v23, %v4238_v56  ;;  %v3972_v57 = vpack.c.bf16 %v2571_v60, %v2435_v49  ;;  %v3978_v50 = vpack.c.bf16 %v2572_v48, %v2436_v29 }
 0x333   :  { %v2227_v28 = vrot.slane %v2219_v39, %v4238_v56  ;;  %v2186_v43 = vrot.slane %v2172_v51, %v4208_v33  ;;  %v2170_v25 = vrot.slane %v2156_v55, %v4208_v33  ;;  %v2234_v27 = vrot.slane %v2220_v53, %v4238_v56 }
 0x334   :  { %v2107_v52 = vrot.slane %v2099_v37, %v4238_v56  ;;  %v2430_v19 = vrot.slane %v2416_v41, %v4238_v56  ;;  %v2534_v32 = vrot.slane %v2520_v14, %v4238_v56  ;;  %v2154_v31 = vrot.slane %v2140_v18, %v4208_v33 }
 0x335   :  { %v2251_v2 = vcombine.low %v2195_v21, %v2227_v28  ;;  %v2252_v3 = vcombine.high %v2195_v21, %v2227_v28  ;;  %v2138_v45 = vrot.slane %v2124_v22, %v4208_v33  ;;  %v2202_v34 = vrot.slane %v2188_v44, %v4238_v56 }
 0x336   :  { %v2075_v12 = vrot.slane %v2067_v46, %v4238_v56  ;;  %v2574_v54 = vcombine.high %v2534_v32, %v2566_v11  ;;  %v2235_v47 = vcombine.low %v2170_v25, %v2186_v43  ;;  %v2100_v39 = vcombine.high %v4728_v4, %v4731_v17 }
 0x337   :  { %3849 = vmatmul.mubr.msk.f32.vlgmr.msra.gmra.mrb[14].mxu0 %vm786_vm2, %v2251_v2  ;;  %3856 = vmatmul.mubr.msk.f32.vlgmr.msra.gmra.mrb[14].mxu1 %vm786_vm2, %v2252_v3  ;;  %v2253_v5 = vcombine.low %v2202_v34, %v2234_v27  ;;  %v2254_v10 = vcombine.high %v2202_v34, %v2234_v27  ;;  %v2203_v38 = vcombine.low %v2138_v45, %v2154_v31 }
 0x338   :  { %3965 = vmatpush3.bf16.xpose.msk.msra.mxu0 %vm4342_vm3, %v3960_v40  ;;  %3971 = vmatpush3.bf16.xpose.msk.msra.mxu1 %vm4342_vm3, %v3966_v42  ;;  %v2398_v40 = vrot.slane %v2384_v59, %v4238_v56  ;;  %v2573_v42 = vcombine.low %v2534_v32, %v2566_v11  ;;  %v2119_v9 = vcombine.low %v2075_v12, %v2107_v52 }
 0x339   :  { %3862 = vmatprep.mubr.msk.f32.mxu0 %vm786_vm2, %v2117_v61  ;;  %3869 = vmatprep.mubr.msk.f32.mxu1 %vm786_vm2, %v2118_v63  ;;  %v2120_v0 = vcombine.high %v2075_v12, %v2107_v52  ;;  %v2068_v63 = vcombine.high %v4717_v15, %v4722_v58  ;;  %v2243_v59 = vrot.slane %v2235_v47, %v4238_v56 }
 0x33a   :  { %3974 = vmatprep.subr.msk.bf16.mxu0 %vm4342_vm3, %v3972_v57  ;;  %3980 = vmatprep.subr.msk.bf16.mxu1 %vm4342_vm3, %v3978_v50  ;;  %v2437_v24 = vcombine.low %v2398_v40, %v2430_v19  ;;  %v2438_v37 = vcombine.high %v2398_v40, %v2430_v19  ;;  %v2114_v4 = vrot.slane %v2100_v39, %v4238_v56 }
 0x33b   :  { %v2211_v17 = vrot.slane %v2203_v38, %v4238_v56  ;;  %v2082_v7 = vrot.slane %v2068_v63, %v4238_v56  ;;  %v2236_v15 = vcombine.high %v2170_v25, %v2186_v43  ;;  %v2204_v28 = vcombine.high %v2138_v45, %v2154_v31 }
 0x33c   :  { %v3984_v46 = vpack.c.bf16 %v2573_v42, %v2437_v24  ;;  %v3990_v61 = vpack.c.bf16 %v2574_v54, %v2438_v37 }
 0x33d   :  { %v2255_v58 = vcombine.low %v2211_v17, %v2243_v59  ;;  %v2256_v21 = vcombine.high %v2211_v17, %v2243_v59  ;;  %v2121_v23 = vcombine.low %v2082_v7, %v2114_v4  ;;  %v2122_v51 = vcombine.high %v2082_v7, %v2114_v4 }
 0x33e   :  { %v2250_v60 = vrot.slane %v2236_v15, %v4238_v56  ;;  %v2218_v48 = vrot.slane %v2204_v28, %v4238_v56 }
 0x33f   :  { %3863 = vmatmul.mubr.msk.f32.vlgmr.msra.gmra.mrb[16].mxu0 %vm786_vm2, %v2253_v5  ;;  %3870 = vmatmul.mubr.msk.f32.vlgmr.msra.gmra.mrb[16].mxu1 %vm786_vm2, %v2254_v10 }
 0x340   :  { %3977 = vmatpush3.bf16.xpose.msk.msra.mxu0 %vm4342_vm3, %v3972_v57  ;;  %3876 = vmatprep.mubr.msk.f32.mxu0 %vm786_vm2, %v2119_v9  ;;  %v2257_v55 = vcombine.low %v2218_v48, %v2250_v60  ;;  %v2258_v53 = vcombine.high %v2218_v48, %v2250_v60 }
 0x341   :  { %3983 = vmatpush3.bf16.xpose.msk.msra.mxu1 %vm4342_vm3, %v3978_v50  ;;  %3883 = vmatprep.mubr.msk.f32.mxu1 %vm786_vm2, %v2120_v0 }
 0x342   :  { %3986 = vmatprep.subr.msk.bf16.mxu0 %vm4342_vm3, %v3984_v46  ;;  %3992 = vmatprep.subr.msk.bf16.mxu1 %vm4342_vm3, %v3990_v61 }
 0x347   :  { %3877 = vmatmul.mubr.msk.f32.vlgmr.msra.gmra.mrb[18].mxu0 %vm786_vm2, %v2255_v58 }
 0x348   :  { %3884 = vmatmul.mubr.msk.f32.vlgmr.msra.gmra.mrb[18].mxu1 %vm786_vm2, %v2256_v21  ;;  %3989 = vmatpush3.bf16.xpose.msk.msra.mxu0 %vm4342_vm3, %v3984_v46 }
 0x349   :  { %3890 = vmatprep.mubr.msk.f32.mxu0 %vm786_vm2, %v2121_v23  ;;  %3995 = vmatpush3.bf16.xpose.msk.msra.mxu1 %vm4342_vm3, %v3990_v61 }
 0x34a   :  { %3897 = vmatprep.mubr.msk.f32.mxu1 %vm786_vm2, %v2122_v51 }
 0x34f   :  { %3891 = vmatmul.mubr.msk.f32.vlgmr.msra.gmra.mrb[20].mxu0 %vm786_vm2, %v2257_v55 }
 0x350   :  { %3898 = vmatmul.mubr.msk.f32.vlgmr.msra.gmra.mrb[20].mxu1 %vm786_vm2, %v2258_v53 }
 0x40a   :  { %v3850_v2 = vpop.f32.mrb[14].mxu0  ;;  %v3857_v3 = vpop.f32.mrb[14].mxu1 }
 0x40b   :  { %v2653_v41 = vpop.f32.mrb[15].mxu0  ;;  %v2740_v14 = vpop.f32.mrb[15].mxu1 }
 0x412   :  { %v3864_v49 = vpop.f32.mrb[16].mxu0  ;;  %v3871_v29 = vpop.f32.mrb[16].mxu1 }
 0x413   :  { %v3407_v18 = vcombine.low %v3850_v2, %v3864_v49  ;;  %v3408_v22 = vcombine.high %v3850_v2, %v3864_v49  ;;  %v3423_v62 = vcombine.low %v3857_v3, %v3871_v29  ;;  %v3424_v44 = vcombine.high %v3857_v3, %v3871_v29  ;;  %v2827_v11 = vpop.f32.mrb[17].mxu0  ;;  %v2914_v57 = vpop.f32.mrb[17].mxu1 }
 0x414   :  { %v3271_v50 = vcombine.low %v2653_v41, %v2827_v11  ;;  %v3272_v43 = vcombine.high %v2653_v41, %v2827_v11  ;;  %v3287_v25 = vcombine.low %v2740_v14, %v2914_v57  ;;  %v3288_v27 = vcombine.high %v2740_v14, %v2914_v57 }
 0x415   :  { %v3415_v52 = vrot.slane %v3407_v18, %v4208_v33  ;;  %v3422_v19 = vrot.slane %v3408_v22, %v4208_v33  ;;  %v3431_v32 = vrot.slane %v3423_v62, %v4208_v33  ;;  %v3438_v31 = vrot.slane %v3424_v44, %v4208_v33 }
 0x416   :  { %v3279_v45 = vrot.slane %v3271_v50, %v4208_v33  ;;  %v3286_v34 = vrot.slane %v3272_v43, %v4208_v33  ;;  %v3295_v12 = vrot.slane %v3287_v25, %v4208_v33  ;;  %v3302_v40 = vrot.slane %v3288_v27, %v4208_v33 }
 0x417   :  { %v3471_v42 = vcombine.low %v3415_v52, %v3431_v32  ;;  %v3472_v54 = vcombine.high %v3415_v52, %v3431_v32  ;;  %v3487_v47 = vcombine.low %v3422_v19, %v3438_v31  ;;  %v3488_v5 = vcombine.high %v3422_v19, %v3438_v31 }
 0x418   :  { %v3335_v10 = vcombine.low %v3279_v45, %v3295_v12  ;;  %v3336_v9 = vcombine.high %v3279_v45, %v3295_v12  ;;  %v3351_v24 = vcombine.low %v3286_v34, %v3302_v40  ;;  %v3352_v37 = vcombine.high %v3286_v34, %v3302_v40 }
 0x419   :  { %v4919_v63 = vrot.slane %v3471_v42, %v4238_v56  ;;  %v3486_v59 = vrot.slane %v3472_v54, %v4238_v56  ;;  %v4923_v4 = vrot.slane %v3487_v47, %v4238_v56  ;;  %v4926_v17 = vrot.slane %v3488_v5, %v4238_v56 }
 0x41a   :  { %v3878_v39 = vpop.f32.mrb[18].mxu0  ;;  %v4929_v28 = vrot.slane %v3335_v10, %v4238_v56  ;;  %v3350_v23 = vrot.slane %v3336_v9, %v4238_v56  ;;  %v3359_v11 = vrot.slane %v3351_v24, %v4238_v56  ;;  %v3366_v57 = vrot.slane %v3352_v37, %v4238_v56 }
 0x41b   :  { %v3885_v38 = vpop.f32.mrb[18].mxu1  ;;  %v3001_v0 = vpop.f32.mrb[19].mxu0 }
 0x41c   :  { %v3088_v46 = vpop.f32.mrb[19].mxu1 }
 0x422   :  { %v3892_v61 = vpop.f32.mrb[20].mxu0 }
 0x423   :  { %v3439_v7 = vcombine.low %v3878_v39, %v3892_v61  ;;  %v3440_v15 = vcombine.high %v3878_v39, %v3892_v61  ;;  %v3899_v58 = vpop.f32.mrb[20].mxu1  ;;  %v3175_v21 = vpop.f32.mrb[21].mxu0 }
 0x424   :  { %v3455_v51 = vcombine.low %v3885_v38, %v3899_v58  ;;  %v3456_v60 = vcombine.high %v3885_v38, %v3899_v58  ;;  %v3303_v48 = vcombine.low %v3001_v0, %v3175_v21  ;;  %v3304_v55 = vcombine.high %v3001_v0, %v3175_v21  ;;  %v3262_v53 = vpop.f32.mrb[21].mxu1 }
 0x425   :  { %v3447_v2 = vrot.slane %v3439_v7, %v4208_v33  ;;  %v3454_v3 = vrot.slane %v3440_v15, %v4208_v33  ;;  %v3319_v41 = vcombine.low %v3088_v46, %v3262_v53  ;;  %v3320_v14 = vcombine.high %v3088_v46, %v3262_v53 }
 0x426   :  { %v3463_v49 = vrot.slane %v3455_v51, %v4208_v33  ;;  %v3470_v29 = vrot.slane %v3456_v60, %v4208_v33  ;;  %v3311_v18 = vrot.slane %v3303_v48, %v4208_v33  ;;  %v3318_v22 = vrot.slane %v3304_v55, %v4208_v33 }
 0x427   :  { %v3327_v62 = vrot.slane %v3319_v41, %v4208_v33  ;;  %v3334_v44 = vrot.slane %v3320_v14, %v4208_v33 }
 0x428   :  { %v3503_v50 = vcombine.low %v3447_v2, %v3463_v49  ;;  %v3504_v43 = vcombine.high %v3447_v2, %v3463_v49  ;;  %v3519_v25 = vcombine.low %v3454_v3, %v3470_v29  ;;  %v3520_v27 = vcombine.high %v3454_v3, %v3470_v29 }
 0x429   :  { %v3367_v52 = vcombine.low %v3311_v18, %v3327_v62  ;;  %v3368_v19 = vcombine.high %v3311_v18, %v3327_v62  ;;  %v3383_v32 = vcombine.low %v3318_v22, %v3334_v44  ;;  %v3384_v31 = vcombine.high %v3318_v22, %v3334_v44 }
 0x42a   :  { %v4943_v45 = vrot.slane %v3503_v50, %v4238_v56  ;;  %v3518_v34 = vrot.slane %v3504_v43, %v4238_v56  ;;  %v3527_v12 = vrot.slane %v3519_v25, %v4238_v56  ;;  %v3534_v33 = vrot.slane %v3520_v27, %v4238_v56 }
 0x42b   :  { %v4949_v40 = vrot.slane %v3367_v52, %v4238_v56  ;;  %v3382_v42 = vrot.slane %v3368_v19, %v4238_v56  ;;  %v3391_v54 = vrot.slane %v3383_v32, %v4238_v56  ;;  %v3398_v47 = vrot.slane %v3384_v31, %v4238_v56 }
 0x42c   :  { %v3536_v5 = vcombine.high %v4919_v63, %v4943_v45  ;;  %v3537_v10 = vcombine.low %v3486_v59, %v3518_v34  ;;  %v3538_v9 = vcombine.high %v3486_v59, %v3518_v34  ;;  %v3539_v24 = vcombine.low %v4923_v4, %v3527_v12 }
 0x42d   :  { %v3400_v37 = vcombine.high %v4929_v28, %v4949_v40  ;;  %v3401_v39 = vcombine.low %v3350_v23, %v3382_v42  ;;  %v3402_v38 = vcombine.high %v3350_v23, %v3382_v42  ;;  %v3403_v0 = vcombine.low %v3359_v11, %v3391_v54  ;;  %v1757_v23 = vpop.permute.xlu0 %1756 }
 0x42e   :  { %3572 = vrot.lane.b32.xlu1 %v3536_v5, %s4057_s3  ;;  %v3540_v46 = vcombine.high %v4923_v4, %v3527_v12  ;;  %v3404_v61 = vcombine.high %v3359_v11, %v3391_v54  ;;  %v3541_v56 = vcombine.low %v4926_v17, %v3534_v33  ;;  %v3405_v7 = vcombine.low %v3366_v57, %v3398_v47  ;;  %v1785_v4 = vpop.permute.xlu1 %1784 }
 0x42f   :  { %3544 = vrot.lane.b32.xlu0 %v3400_v37, %s4057_s3  ;;  %v3542_v59 = vcombine.high %v4926_v17, %v3534_v33  ;;  %v3406_v15 = vcombine.high %v3366_v57, %v3398_v47  ;;  %v3535_v58 = vcombine.low %v4919_v63, %v4943_v45  ;;  %v3399_v21 = vcombine.low %v4929_v28, %v4949_v40 }
 0x430   :  { %v1824_v41 = vsel %vm786_vm2, %v1747_v13, %v1785_v4  ;;  %v1811_v14 = vsel %vm786_vm2, %v1611_v16, %v1757_v23 }
 0x431   :  { %v1761_v17 = vpop.permute.xlu0 %1760 }
 0x432   :  { %3576 = vrot.lane.b32.xlu1 %v3537_v10, %s4055_s5  ;;  %v1789_v63 = vpop.permute.xlu1 %1788  ;;  %v1813_v29 = vsel %vm1812_vm4, %v1811_v14, %v1761_v17 }
 0x433   :  { %3548 = vrot.lane.b32.xlu0 %v3401_v39, %s4055_s5  ;;  %v1825_v49 = vsel %vm1812_vm4, %v1824_v41, %v1789_v63 }
 0x435   :  { %v1765_v51 = vpop.permute.xlu0 %1764 }
 0x436   :  { %3580 = vrot.lane.b32.xlu1 %v3538_v9, %s4056_s6  ;;  %v1793_v28 = vpop.permute.xlu1 %1792  ;;  %v1815_v22 = vsel %vm1814_vm5, %v1813_v29, %v1765_v51 }
 0x437   :  { %3552 = vrot.lane.b32.xlu0 %v3402_v38, %s4056_s6  ;;  %v1826_v18 = vsel %vm1814_vm5, %v1825_v49, %v1793_v28 }
 0x439   :  { %v1769_v48 = vpop.permute.xlu0 %1768 }
 0x43a   :  { %3584 = vrot.lane.b32.xlu1 %v3539_v24, %s4053_s27  ;;  %v1797_v60 = vpop.permute.xlu1 %1796  ;;  %v1817_v20 = vsel %vm1816_vm6, %v1815_v22, %v1769_v48 }
 0x43b   :  { %3556 = vrot.lane.b32.xlu0 %v3403_v0, %s4053_s27  ;;  %v1827_v35 = vsel %vm1816_vm6, %v1826_v18, %v1797_v60 }
 0x43d   :  { %v1773_v53 = vpop.permute.xlu0 %1772 }
 0x43e   :  { %3588 = vrot.lane.b32.xlu1 %v3540_v46, %s4054_s28  ;;  %v1801_v55 = vpop.permute.xlu1 %1800  ;;  %v1819_v16 = vsel %vm1818_vm7, %v1817_v20, %v1773_v53 }
 0x43f   :  { %3560 = vrot.lane.b32.xlu0 %v3404_v61, %s4054_s28  ;;  %v1828_v36 = vsel %vm1818_vm7, %v1827_v35, %v1801_v55 }
 0x441   :  { %v1777_v3 = vpop.permute.xlu0 %1776 }
 0x442   :  { %3592 = vrot.lane.b32.xlu1 %v3541_v56, %s4051_s25  ;;  %v1805_v2 = vpop.permute.xlu1 %1804  ;;  %v1821_v44 = vsel %vm1820_vm8, %v1819_v16, %v1777_v3 }
 0x443   :  { %3564 = vrot.lane.b32.xlu0 %v3405_v7, %s4051_s25  ;;  %v1829_v62 = vsel %vm1820_vm8, %v1828_v36, %v1805_v2 }
 0x445   :  { %v1781_v1 = vpop.permute.xlu0 %1780 }
 0x446   :  { %3596 = vrot.lane.b32.xlu1 %v3542_v59, %s4052_s26  ;;  %v1809_v13 = vpop.permute.xlu1 %1808  ;;  %v1823_v57 = vsel %vm1822_vm9, %v1821_v44, %v1781_v1 }
 0x447   :  { %3568 = vrot.lane.b32.xlu0 %v3406_v15, %s4052_s26  ;;  %v1830_v11 = vsel %vm1822_vm9, %v1829_v62, %v1809_v13 }
 0x448   :  { %v1831_v50 = vmax.f32 %v1823_v57, %v1830_v11 }
 0x466   :  { %1832 = vmax.xlane.f32.xlu0 %v1831_v50 }
 0x4a0   :  { %v3573_v43 = vpop.permute.xlu1 %3572 }
 0x4a1   :  { %v3545_v25 = vpop.permute.xlu0 %3544  ;;  %v3606_v33 = vsel %vm786_vm2, %v3535_v58, %v3573_v43  ;;  %v23_v58 = vld [vmem:[%s5036_s2 + $0x10] sm:$0xff]  ;;  %s4060_s2 = smov [#allocation2]  }
 0x4a2   :  { %v3599_v40 = vsel %vm786_vm2, %v3399_v21, %v3545_v25  ;;  %s3638_s11 = sshll.u32 %s4060_s2, 4  ;;  %s3639_s11 = int_to_ptr.vmem [resolvable:$true] %s3638_s11 }
 0x4a3   :  { %s4025_s12 = scalar_lea.vmem %s3639_s11, 512  ;;  %p4030_p1 = scmp.lt.s32.totalorder %s3639_s11, %s3639_s11 }
 0x4a4   :  { %v3577_v27 = vpop.permute.xlu1 %3576  ;;  %p4026_p0 = scmp.ne.s32.totalorder %s3639_s11, %s4025_s12  ;;  %p4031_p2 = scmp.lt.s32.totalorder %s4025_s12, %s4025_s12 }
 0x4a5   :  { %v3549_v52 = vpop.permute.xlu0 %3548  ;;  %v3607_v42 = vsel %vm1812_vm4, %v3606_v33, %v3577_v27 }
 0x4a6   :  { %v3600_v47 = vsel %vm1812_vm4, %v3599_v40, %v3549_v52  ;;  %p4032_p3 = por %p4031_p2, %p4030_p1 }
 0x4a8   :  { %v3581_v19 = vpop.permute.xlu1 %3580  ;;  %p4033_p4 = pnand %p4032_p3, %p4026_p0 }
 0x4a9   :  { %v3553_v32 = vpop.permute.xlu0 %3552  ;;  %v3608_v5 = vsel %vm1814_vm5, %v3607_v42, %v3581_v19 }
 0x4aa   :  { %v3601_v9 = vsel %vm1814_vm5, %v3600_v47, %v3553_v32 }
 0x4ac   :  { %v3585_v31 = vpop.permute.xlu1 %3584 }
 0x4ad   :  { %v3557_v45 = vpop.permute.xlu0 %3556  ;;  %v3609_v24 = vsel %vm1816_vm6, %v3608_v5, %v3585_v31 }
 0x4ae   :  { %v3602_v37 = vsel %vm1816_vm6, %v3601_v9, %v3557_v45 }
 0x4b0   :  { %v3589_v34 = vpop.permute.xlu1 %3588 }
 0x4b1   :  { %v3561_v12 = vpop.permute.xlu0 %3560  ;;  %v3610_v39 = vsel %vm1818_vm7, %v3609_v24, %v3589_v34 }
 0x4b2   :  { %v3603_v38 = vsel %vm1818_vm7, %v3602_v37, %v3561_v12 }
 0x4b4   :  { %v3593_v54 = vpop.permute.xlu1 %3592 }
 0x4b5   :  { %v3565_v10 = vpop.permute.xlu0 %3564  ;;  %v3611_v0 = vsel %vm1820_vm8, %v3610_v39, %v3593_v54 }
 0x4b6   :  { %v3604_v61 = vsel %vm1820_vm8, %v3603_v38, %v3565_v10 }
 0x4b8   :  { %v3597_v46 = vpop.permute.xlu1 %3596 }
 0x4b9   :  { %v3612_v56 = vsel %vm1822_vm9, %v3611_v0, %v3597_v46  ;;  %v3569_v7 = vpop.permute.xlu0 %3568 }
 0x4ba   :  { %v3605_v59 = vsel %vm1822_vm9, %v3604_v61, %v3569_v7 }
 0x4bb   :  { %v3613_v15 = vmax.f32 %v3605_v59, %v3612_v56 }
 0x4bd   :  { %3614 = vmax.xlane.f32.xlu1 %v3613_v15 }
 0x4ce   :  { %38 = vperm.xlu1 %4010, %v23_v58  }
 0x4f3   :  { %v1833_v21 = vpop.xlane.xlu0 %1832 }
 0x4f4   :  { %v1834_v4 = vsub.f32 %v1823_v57, %v1833_v21  ;;  %v1835_v23 = vsub.f32 %v1830_v11, %v1833_v21 }
 0x4f6   :  { %v1836_v63 = vmul.f32 1.442695, %v1834_v4  ;;  %v1838_v17 = vmul.f32 1.442695, %v1835_v23 }
 0x4f8   :  { %4013 = vpow2.f32 %v1836_v63 }
 0x4f9   :  { %4015 = vpow2.f32 %v1838_v17 }
 0x502   :  { %v4014_v28 = vpop.eup %4013 }
 0x503   :  { %v4016_v51 = vpop.eup %4015 }
 0x504   :  { %v1840_v60 = vadd.f32 %v4016_v51, %v4014_v28 }
 0x506   :  { %1841 = vadd.xlane.f32.xlu0 %v1840_v60 }
 0x54a   :  { %v3615_v48 = vpop.xlane.xlu1 %3614 }
 0x54b   :  { %v3616_v55 = vsub.f32 %v3605_v59, %v3615_v48  ;;  %v3617_v53 = vsub.f32 %v3612_v56, %v3615_v48 }
 0x54d   :  { %v3618_v2 = vmul.f32 1.442695, %v3616_v55  ;;  %v3620_v3 = vmul.f32 1.442695, %v3617_v53 }
 0x54e   :  { %v39_v41 = vpop.permute.xlu1 %38 }
 0x54f   :  { %4017 = vpow2.f32 %v3618_v2  ;;  %v1937_v14 = vadd.f32 %v4667_v8, %v39_v41  ;;  %v1939_v49 = vadd.f32 %v4669_v26, %v39_v41  ;;  %v137_v13 = vadd.f32 %v4485_v6, %v39_v41 }
 0x550   :  { %4019 = vpow2.f32 %v3620_v3  ;;  %v139_v1 = vadd.f32 %v4487_v30, %v39_v41 }
 0x559   :  { %v4018_v29 = vpop.eup %4017 }
 0x55a   :  { %v4020_v18 = vpop.eup %4019 }
 0x55b   :  { %v3622_v22 = vadd.f32 %v4020_v18, %v4018_v29 }
 0x55d   :  { %3623 = vadd.xlane.f32.xlu0 %v3622_v22 }
 0x593   :  { %v1842_v35 = vpop.xlane.xlu0 %1841 }
 0x594   :  { %4021 = vrcp.f32 %v1842_v35 }
 0x59e   :  { %v4022_v20 = vpop.eup %4021 }
 0x59f   :  { %v1844_v36 = vmul.f32 %v4022_v20, %v4014_v28  ;;  %v1845_v16 = vmul.f32 %v4022_v20, %v4016_v51 }
 0x5a1   :  { %v1846_v62 = vmul.f32 %v1844_v36, %v137_v13  ;;  %v1847_v44 = vmul.f32 %v1845_v16, %v139_v1 }
 0x5a3   :  { %1848 = vst [vmem:[#allocation2] sm:$0xff] %v1846_v62  ;;  %1849 = vst [vmem:[#allocation2 + $0x8] sm:$0xff] %v1847_v44 }
 0x5ea   :  { %v3624_v8 = vpop.xlane.xlu0 %3623 }
 0x5eb   :  { %4023 = vrcp.f32 %v3624_v8 }
 0x5f5   :  { %v4024_v26 = vpop.eup %4023 }
 0x5f6   :  { %v3626_v11 = vmul.f32 %v4024_v26, %v4018_v29  ;;  %v3627_v57 = vmul.f32 %v4024_v26, %v4020_v18 }
 0x5f8   :  { %v3628_v50 = vmul.f32 %v3626_v11, %v1937_v14  ;;  %v3629_v43 = vmul.f32 %v3627_v57, %v1939_v49 }
 0x5fa   :  { %3631 = vst [vmem:[#allocation2 + $0x10] sm:$0xff] %v3628_v50  ;;  %3632 = vst [vmem:[#allocation2 + $0x18] sm:$0xff] %v3629_v43 }
 0x5fb   :  { %4036 = shalt.err (!%p4033_p4)
}
 0x5fc   :  { %s4037_s15 = scalar_lea.hbm %s5038_s4, 512 }
 0x5fd   :  { %p4038_p5 = scmp.ne.s32.totalorder %s5038_s4, %s4037_s15  ;;  %p4041_p6 = scmp.lt.u32.totalorder %s4037_s15, %s5038_s4 }
 0x5ff   :  { %p4043_p7 = pnand %p4041_p6, %p4038_p5 }
 0x601   :  { %4046 = shalt.err (!%p4043_p7)
}
 0x602   :  { %s4061_s20 = smov 256  }
 0x603   :  { %3644 = dma.vmem_to_hbm [thread:$0]  %s3639_s11, 512, %s5038_s4, [#allocation3], %s4061_s20, %s4061_s20, %s4057_s3  }
 0x604   :  { %4047 = dma.done.wait [#allocation3], 512  }
 0x605   :  { %4048 = vsyncadd [#allocation3], 4294966784 }
 0x606   :  { %3648 = vsyncpa [#allocation3], 1 }

</bundles_post_ra>
